<compile_context>
chip_gen: v5e
topology: v5e:2x2
jax: 0.10.0
libtpu: 0.0.40
codegen_flags: <defaults>
</compile_context>

<pallas_src>
import math

import jax
import jax.numpy as jnp
from jax.experimental import pallas as pl
from jax.experimental.pallas import tpu as pltpu


# ---------------------------------------------------------------------------
# Fused kernel: conv5x5+ReLU -> 5 dense layers (ReLU on all but the last).
# Outputs: saida (1, 10) and h1 (1, 112) (reshaped to BA19_novo outside).
# ---------------------------------------------------------------------------
def estagio_ii_kernel(img_ref, cw_ref, cb_ref,
                      w1_ref, b1_ref, w2_ref, b2_ref, w3_ref, b3_ref,
                      w4_ref, b4_ref, w5_ref, b5_ref,
                      saida_ref, h1_ref):
    # ---- BA17: 5x5 valid conv (1 in / 1 out channel) + bias + ReLU ----------
    # img: (32, 28) f32; output: (28, 24)
    img = img_ref[...]
    # Hoist the 5 lane-shifted views once; reuse across the 5 sublane offsets.
    cols = [img[:, dj:dj + 24] for dj in range(5)]          # each (32, 24)
    acc = jnp.zeros((28, 24), jnp.float32)
    for di in range(5):                                      # fully unrolled 25 taps
        for dj in range(5):
            acc = acc + cw_ref[5 * di + dj] * cols[dj][di:di + 28, :]
    conv = jnp.maximum(acc + cb_ref[0], 0.0)                 # (28, 24), ReLU

    # ---- BA19_1: flatten-free first dense ----------------------------------
    # h1 = flatten(conv) @ W1^T + b1  ==  b1 + sum_i conv[i,:] @ W1_rs[i]
    # with W1_rs[i, j, f] == W1^T[i*24 + j, f]  (row-major, matches torch flatten)
    h1 = b1_ref[...]                                         # (1, 112)
    for i in range(28):                                      # 28 small MXU matmuls
        h1 = h1 + jnp.dot(conv[i:i + 1, :], w1_ref[i],
                          preferred_element_type=jnp.float32)
    h1 = jnp.maximum(h1, 0.0)                                # ReLU
    h1_ref[...] = h1                                         # exported -> BA19_novo

    # ---- Remaining dense stack ----------------------------------------------
    def dense(x, w_ref, b_ref):
        return jnp.dot(x, w_ref[...], preferred_element_type=jnp.float32) + b_ref[...]

    h2 = jnp.maximum(dense(h1, w2_ref, b2_ref), 0.0)         # (1, 28)
    h3 = jnp.maximum(dense(h2, w3_ref, b3_ref), 0.0)         # (1, 32)
    h4 = jnp.maximum(dense(h3, w4_ref, b4_ref), 0.0)         # (1, 64)
    saida_ref[...] = dense(h4, w5_ref, b5_ref)               # (1, 10), no ReLU


# ---------------------------------------------------------------------------
# Parameter init (deterministic, PyTorch-default-like uniform(-1/sqrt(fan_in)))
# ---------------------------------------------------------------------------
def _uniform(key, shape, fan_in):
    bound = 1.0 / math.sqrt(fan_in)
    return jax.random.uniform(key, shape, jnp.float32, -bound, bound)


def init_params(key):
    ks = jax.random.split(key, 12)
    p = {}
    p["conv_w"] = _uniform(ks[0], (25,), 25)       # Conv2d(1,1,5) weight, flat 1-D for SMEM
    p["conv_b"] = _uniform(ks[1], (1,), 25)
    # Linear weights stored transposed: (in, out); biases as (1, out).
    w1t = _uniform(ks[2], (672, 112), 672)
    p["w1_rs"] = w1t.reshape(28, 24, 112)          # row-major: matches torch H-then-W flatten
    p["b1"] = _uniform(ks[3], (1, 112), 672)
    p["w2t"] = _uniform(ks[4], (112, 28), 112)
    p["b2"] = _uniform(ks[5], (1, 28), 112)
    p["w3t"] = _uniform(ks[6], (28, 32), 28)
    p["b3"] = _uniform(ks[7], (1, 32), 28)
    p["w4t"] = _uniform(ks[8], (32, 64), 32)
    p["b4"] = _uniform(ks[9], (1, 64), 32)
    p["w5t"] = _uniform(ks[10], (64, 10), 64)
    p["b5"] = _uniform(ks[11], (1, 10), 64)
    return p


# ---------------------------------------------------------------------------
# Forward pass == estagio_II.forward(entrada_visual, BA19_antigo)
# ---------------------------------------------------------------------------
def estagio_ii_forward(entrada_visual, ba19_antigo, params):
    # torch.cat([entrada_visual, BA19_antigo]) then reshape(1, 1, 32, 28)
    img = jnp.concatenate([entrada_visual, ba19_antigo], axis=0)
    img = img.reshape(32, 28).astype(jnp.float32)

    vmem = pl.BlockSpec(memory_space=pltpu.MemorySpace.VMEM)
    smem = pl.BlockSpec(memory_space=pltpu.MemorySpace.SMEM)

    saida, h1 = pl.pallas_call(
        estagio_ii_kernel,
        out_shape=(jax.ShapeDtypeStruct((1, 10), jnp.float32),
                   jax.ShapeDtypeStruct((1, 112), jnp.float32)),
        in_specs=[vmem, smem, smem] + [vmem] * 10,
        out_specs=(vmem, vmem),
    )(img, params["conv_w"], params["conv_b"],
      params["w1_rs"], params["b1"], params["w2t"], params["b2"],
      params["w3t"], params["b3"], params["w4t"], params["b4"],
      params["w5t"], params["b5"])

    saida = saida.reshape(10)          # torch.reshape(saida, [10])
    ba19_novo = h1.reshape(4, 28)      # torch.reshape(af_BA19_1, [4, 28])
    return saida, ba19_novo


if __name__ == "__main__":
    key = jax.random.PRNGKey(0)
    k_in, k_ba19, k_par = jax.random.split(key, 3)

    # Forward implies: entrada_visual (28, 28), BA19_antigo (4, 28) -> concat (32, 28)
    entrada_visual = jax.random.normal(k_in, (28, 28), jnp.float32)
    ba19_antigo = jax.random.normal(k_ba19, (4, 28), jnp.float32)
    params = init_params(k_par)

    fwd = jax.jit(estagio_ii_forward)
    saida, ba19_novo = fwd(entrada_visual, ba19_antigo, params)
    jax.block_until_ready((saida, ba19_novo))

    assert saida.shape == (10,), saida.shape
    assert ba19_novo.shape == (4, 28), ba19_novo.shape
    print("KERNEL_OK")
</pallas_src>

<mosaic_0001>
module attributes {stable_mosaic.version = 11 : i64} {
  func.func @estagio_ii_kernel(%arg0: memref<32x28xf32, #tpu.memory_space<vmem>>, %arg1: memref<25xf32, #tpu.memory_space<smem>>, %arg2: memref<1xf32, #tpu.memory_space<smem>>, %arg3: memref<28x24x112xf32, #tpu.memory_space<vmem>>, %arg4: memref<1x112xf32, #tpu.memory_space<vmem>>, %arg5: memref<112x28xf32, #tpu.memory_space<vmem>>, %arg6: memref<1x28xf32, #tpu.memory_space<vmem>>, %arg7: memref<28x32xf32, #tpu.memory_space<vmem>>, %arg8: memref<1x32xf32, #tpu.memory_space<vmem>>, %arg9: memref<32x64xf32, #tpu.memory_space<vmem>>, %arg10: memref<1x64xf32, #tpu.memory_space<vmem>>, %arg11: memref<64x10xf32, #tpu.memory_space<vmem>>, %arg12: memref<1x10xf32, #tpu.memory_space<vmem>>, %arg13: memref<1x10xf32, #tpu.memory_space<vmem>>, %arg14: memref<1x112xf32, #tpu.memory_space<vmem>>) attributes {dimension_semantics = [], scalar_prefetch = 0 : i64, scratch_operands = 0 : i64, tpu.core_type = #tpu.core_type<tc>} {
    %c0 = arith.constant 0 : index
    %c0_0 = arith.constant 0 : index
    %0 = vector.load %arg0[%c0, %c0_0] : memref<32x28xf32, #tpu.memory_space<vmem>>, vector<32x28xf32>
    %1 = vector.extract_strided_slice %0 {offsets = [0, 0], sizes = [32, 24], strides = [1, 1]} : vector<32x28xf32> to vector<32x24xf32>
    %2 = vector.extract_strided_slice %0 {offsets = [0, 1], sizes = [32, 24], strides = [1, 1]} : vector<32x28xf32> to vector<32x24xf32>
    %3 = vector.extract_strided_slice %0 {offsets = [0, 2], sizes = [32, 24], strides = [1, 1]} : vector<32x28xf32> to vector<32x24xf32>
    %4 = vector.extract_strided_slice %0 {offsets = [0, 3], sizes = [32, 24], strides = [1, 1]} : vector<32x28xf32> to vector<32x24xf32>
    %5 = vector.extract_strided_slice %0 {offsets = [0, 4], sizes = [32, 24], strides = [1, 1]} : vector<32x28xf32> to vector<32x24xf32>
    %cst = arith.constant 0.000000e+00 : f32
    %6 = vector.broadcast %cst : f32 to vector<28x24xf32>
    %c0_1 = arith.constant 0 : index
    %7 = memref.load %arg1[%c0_1] : memref<25xf32, #tpu.memory_space<smem>>
    %8 = vector.extract_strided_slice %1 {offsets = [0, 0], sizes = [28, 24], strides = [1, 1]} : vector<32x24xf32> to vector<28x24xf32>
    %9 = vector.broadcast %7 : f32 to vector<28x24xf32>
    %10 = arith.mulf %9, %8 : vector<28x24xf32>
    %11 = arith.addf %6, %10 : vector<28x24xf32>
    %c1 = arith.constant 1 : index
    %12 = memref.load %arg1[%c1] : memref<25xf32, #tpu.memory_space<smem>>
    %13 = vector.extract_strided_slice %2 {offsets = [0, 0], sizes = [28, 24], strides = [1, 1]} : vector<32x24xf32> to vector<28x24xf32>
    %14 = vector.broadcast %12 : f32 to vector<28x24xf32>
    %15 = arith.mulf %14, %13 : vector<28x24xf32>
    %16 = arith.addf %11, %15 : vector<28x24xf32>
    %c2 = arith.constant 2 : index
    %17 = memref.load %arg1[%c2] : memref<25xf32, #tpu.memory_space<smem>>
    %18 = vector.extract_strided_slice %3 {offsets = [0, 0], sizes = [28, 24], strides = [1, 1]} : vector<32x24xf32> to vector<28x24xf32>
    %19 = vector.broadcast %17 : f32 to vector<28x24xf32>
    %20 = arith.mulf %19, %18 : vector<28x24xf32>
    %21 = arith.addf %16, %20 : vector<28x24xf32>
    %c3 = arith.constant 3 : index
    %22 = memref.load %arg1[%c3] : memref<25xf32, #tpu.memory_space<smem>>
    %23 = vector.extract_strided_slice %4 {offsets = [0, 0], sizes = [28, 24], strides = [1, 1]} : vector<32x24xf32> to vector<28x24xf32>
    %24 = vector.broadcast %22 : f32 to vector<28x24xf32>
    %25 = arith.mulf %24, %23 : vector<28x24xf32>
    %26 = arith.addf %21, %25 : vector<28x24xf32>
    %c4 = arith.constant 4 : index
    %27 = memref.load %arg1[%c4] : memref<25xf32, #tpu.memory_space<smem>>
    %28 = vector.extract_strided_slice %5 {offsets = [0, 0], sizes = [28, 24], strides = [1, 1]} : vector<32x24xf32> to vector<28x24xf32>
    %29 = vector.broadcast %27 : f32 to vector<28x24xf32>
    %30 = arith.mulf %29, %28 : vector<28x24xf32>
    %31 = arith.addf %26, %30 : vector<28x24xf32>
    %c5 = arith.constant 5 : index
    %32 = memref.load %arg1[%c5] : memref<25xf32, #tpu.memory_space<smem>>
    %33 = vector.extract_strided_slice %1 {offsets = [1, 0], sizes = [28, 24], strides = [1, 1]} : vector<32x24xf32> to vector<28x24xf32>
    %34 = vector.broadcast %32 : f32 to vector<28x24xf32>
    %35 = arith.mulf %34, %33 : vector<28x24xf32>
    %36 = arith.addf %31, %35 : vector<28x24xf32>
    %c6 = arith.constant 6 : index
    %37 = memref.load %arg1[%c6] : memref<25xf32, #tpu.memory_space<smem>>
    %38 = vector.extract_strided_slice %2 {offsets = [1, 0], sizes = [28, 24], strides = [1, 1]} : vector<32x24xf32> to vector<28x24xf32>
    %39 = vector.broadcast %37 : f32 to vector<28x24xf32>
    %40 = arith.mulf %39, %38 : vector<28x24xf32>
    %41 = arith.addf %36, %40 : vector<28x24xf32>
    %c7 = arith.constant 7 : index
    %42 = memref.load %arg1[%c7] : memref<25xf32, #tpu.memory_space<smem>>
    %43 = vector.extract_strided_slice %3 {offsets = [1, 0], sizes = [28, 24], strides = [1, 1]} : vector<32x24xf32> to vector<28x24xf32>
    %44 = vector.broadcast %42 : f32 to vector<28x24xf32>
    %45 = arith.mulf %44, %43 : vector<28x24xf32>
    %46 = arith.addf %41, %45 : vector<28x24xf32>
    %c8 = arith.constant 8 : index
    %47 = memref.load %arg1[%c8] : memref<25xf32, #tpu.memory_space<smem>>
    %48 = vector.extract_strided_slice %4 {offsets = [1, 0], sizes = [28, 24], strides = [1, 1]} : vector<32x24xf32> to vector<28x24xf32>
    %49 = vector.broadcast %47 : f32 to vector<28x24xf32>
    %50 = arith.mulf %49, %48 : vector<28x24xf32>
    %51 = arith.addf %46, %50 : vector<28x24xf32>
    %c9 = arith.constant 9 : index
    %52 = memref.load %arg1[%c9] : memref<25xf32, #tpu.memory_space<smem>>
    %53 = vector.extract_strided_slice %5 {offsets = [1, 0], sizes = [28, 24], strides = [1, 1]} : vector<32x24xf32> to vector<28x24xf32>
    %54 = vector.broadcast %52 : f32 to vector<28x24xf32>
    %55 = arith.mulf %54, %53 : vector<28x24xf32>
    %56 = arith.addf %51, %55 : vector<28x24xf32>
    %c10 = arith.constant 10 : index
    %57 = memref.load %arg1[%c10] : memref<25xf32, #tpu.memory_space<smem>>
    %58 = vector.extract_strided_slice %1 {offsets = [2, 0], sizes = [28, 24], strides = [1, 1]} : vector<32x24xf32> to vector<28x24xf32>
    %59 = vector.broadcast %57 : f32 to vector<28x24xf32>
    %60 = arith.mulf %59, %58 : vector<28x24xf32>
    %61 = arith.addf %56, %60 : vector<28x24xf32>
    %c11 = arith.constant 11 : index
    %62 = memref.load %arg1[%c11] : memref<25xf32, #tpu.memory_space<smem>>
    %63 = vector.extract_strided_slice %2 {offsets = [2, 0], sizes = [28, 24], strides = [1, 1]} : vector<32x24xf32> to vector<28x24xf32>
    %64 = vector.broadcast %62 : f32 to vector<28x24xf32>
    %65 = arith.mulf %64, %63 : vector<28x24xf32>
    %66 = arith.addf %61, %65 : vector<28x24xf32>
    %c12 = arith.constant 12 : index
    %67 = memref.load %arg1[%c12] : memref<25xf32, #tpu.memory_space<smem>>
    %68 = vector.extract_strided_slice %3 {offsets = [2, 0], sizes = [28, 24], strides = [1, 1]} : vector<32x24xf32> to vector<28x24xf32>
    %69 = vector.broadcast %67 : f32 to vector<28x24xf32>
    %70 = arith.mulf %69, %68 : vector<28x24xf32>
    %71 = arith.addf %66, %70 : vector<28x24xf32>
    %c13 = arith.constant 13 : index
    %72 = memref.load %arg1[%c13] : memref<25xf32, #tpu.memory_space<smem>>
    %73 = vector.extract_strided_slice %4 {offsets = [2, 0], sizes = [28, 24], strides = [1, 1]} : vector<32x24xf32> to vector<28x24xf32>
    %74 = vector.broadcast %72 : f32 to vector<28x24xf32>
    %75 = arith.mulf %74, %73 : vector<28x24xf32>
    %76 = arith.addf %71, %75 : vector<28x24xf32>
    %c14 = arith.constant 14 : index
    %77 = memref.load %arg1[%c14] : memref<25xf32, #tpu.memory_space<smem>>
    %78 = vector.extract_strided_slice %5 {offsets = [2, 0], sizes = [28, 24], strides = [1, 1]} : vector<32x24xf32> to vector<28x24xf32>
    %79 = vector.broadcast %77 : f32 to vector<28x24xf32>
    %80 = arith.mulf %79, %78 : vector<28x24xf32>
    %81 = arith.addf %76, %80 : vector<28x24xf32>
    %c15 = arith.constant 15 : index
    %82 = memref.load %arg1[%c15] : memref<25xf32, #tpu.memory_space<smem>>
    %83 = vector.extract_strided_slice %1 {offsets = [3, 0], sizes = [28, 24], strides = [1, 1]} : vector<32x24xf32> to vector<28x24xf32>
    %84 = vector.broadcast %82 : f32 to vector<28x24xf32>
    %85 = arith.mulf %84, %83 : vector<28x24xf32>
    %86 = arith.addf %81, %85 : vector<28x24xf32>
    %c16 = arith.constant 16 : index
    %87 = memref.load %arg1[%c16] : memref<25xf32, #tpu.memory_space<smem>>
    %88 = vector.extract_strided_slice %2 {offsets = [3, 0], sizes = [28, 24], strides = [1, 1]} : vector<32x24xf32> to vector<28x24xf32>
    %89 = vector.broadcast %87 : f32 to vector<28x24xf32>
    %90 = arith.mulf %89, %88 : vector<28x24xf32>
    %91 = arith.addf %86, %90 : vector<28x24xf32>
    %c17 = arith.constant 17 : index
    %92 = memref.load %arg1[%c17] : memref<25xf32, #tpu.memory_space<smem>>
    %93 = vector.extract_strided_slice %3 {offsets = [3, 0], sizes = [28, 24], strides = [1, 1]} : vector<32x24xf32> to vector<28x24xf32>
    %94 = vector.broadcast %92 : f32 to vector<28x24xf32>
    %95 = arith.mulf %94, %93 : vector<28x24xf32>
    %96 = arith.addf %91, %95 : vector<28x24xf32>
    %c18 = arith.constant 18 : index
    %97 = memref.load %arg1[%c18] : memref<25xf32, #tpu.memory_space<smem>>
    %98 = vector.extract_strided_slice %4 {offsets = [3, 0], sizes = [28, 24], strides = [1, 1]} : vector<32x24xf32> to vector<28x24xf32>
    %99 = vector.broadcast %97 : f32 to vector<28x24xf32>
    %100 = arith.mulf %99, %98 : vector<28x24xf32>
    %101 = arith.addf %96, %100 : vector<28x24xf32>
    %c19 = arith.constant 19 : index
    %102 = memref.load %arg1[%c19] : memref<25xf32, #tpu.memory_space<smem>>
    %103 = vector.extract_strided_slice %5 {offsets = [3, 0], sizes = [28, 24], strides = [1, 1]} : vector<32x24xf32> to vector<28x24xf32>
    %104 = vector.broadcast %102 : f32 to vector<28x24xf32>
    %105 = arith.mulf %104, %103 : vector<28x24xf32>
    %106 = arith.addf %101, %105 : vector<28x24xf32>
    %c20 = arith.constant 20 : index
    %107 = memref.load %arg1[%c20] : memref<25xf32, #tpu.memory_space<smem>>
    %108 = vector.extract_strided_slice %1 {offsets = [4, 0], sizes = [28, 24], strides = [1, 1]} : vector<32x24xf32> to vector<28x24xf32>
    %109 = vector.broadcast %107 : f32 to vector<28x24xf32>
    %110 = arith.mulf %109, %108 : vector<28x24xf32>
    %111 = arith.addf %106, %110 : vector<28x24xf32>
    %c21 = arith.constant 21 : index
    %112 = memref.load %arg1[%c21] : memref<25xf32, #tpu.memory_space<smem>>
    %113 = vector.extract_strided_slice %2 {offsets = [4, 0], sizes = [28, 24], strides = [1, 1]} : vector<32x24xf32> to vector<28x24xf32>
    %114 = vector.broadcast %112 : f32 to vector<28x24xf32>
    %115 = arith.mulf %114, %113 : vector<28x24xf32>
    %116 = arith.addf %111, %115 : vector<28x24xf32>
    %c22 = arith.constant 22 : index
    %117 = memref.load %arg1[%c22] : memref<25xf32, #tpu.memory_space<smem>>
    %118 = vector.extract_strided_slice %3 {offsets = [4, 0], sizes = [28, 24], strides = [1, 1]} : vector<32x24xf32> to vector<28x24xf32>
    %119 = vector.broadcast %117 : f32 to vector<28x24xf32>
    %120 = arith.mulf %119, %118 : vector<28x24xf32>
    %121 = arith.addf %116, %120 : vector<28x24xf32>
    %c23 = arith.constant 23 : index
    %122 = memref.load %arg1[%c23] : memref<25xf32, #tpu.memory_space<smem>>
    %123 = vector.extract_strided_slice %4 {offsets = [4, 0], sizes = [28, 24], strides = [1, 1]} : vector<32x24xf32> to vector<28x24xf32>
    %124 = vector.broadcast %122 : f32 to vector<28x24xf32>
    %125 = arith.mulf %124, %123 : vector<28x24xf32>
    %126 = arith.addf %121, %125 : vector<28x24xf32>
    %c24 = arith.constant 24 : index
    %127 = memref.load %arg1[%c24] : memref<25xf32, #tpu.memory_space<smem>>
    %128 = vector.extract_strided_slice %5 {offsets = [4, 0], sizes = [28, 24], strides = [1, 1]} : vector<32x24xf32> to vector<28x24xf32>
    %129 = vector.broadcast %127 : f32 to vector<28x24xf32>
    %130 = arith.mulf %129, %128 : vector<28x24xf32>
    %131 = arith.addf %126, %130 : vector<28x24xf32>
    %c0_2 = arith.constant 0 : index
    %132 = memref.load %arg2[%c0_2] : memref<1xf32, #tpu.memory_space<smem>>
    %133 = vector.broadcast %132 : f32 to vector<28x24xf32>
    %134 = arith.addf %131, %133 : vector<28x24xf32>
    %cst_3 = arith.constant 0.000000e+00 : f32
    %135 = vector.broadcast %cst_3 : f32 to vector<28x24xf32>
    %136 = arith.maximumf %134, %135 : vector<28x24xf32>
    %c0_4 = arith.constant 0 : index
    %c0_5 = arith.constant 0 : index
    %137 = vector.load %arg4[%c0_4, %c0_5] : memref<1x112xf32, #tpu.memory_space<vmem>>, vector<1x112xf32>
    %138 = vector.extract_strided_slice %136 {offsets = [0, 0], sizes = [1, 24], strides = [1, 1]} : vector<28x24xf32> to vector<1x24xf32>
    %c0_6 = arith.constant 0 : index
    %c0_7 = arith.constant 0 : index
    %c0_8 = arith.constant 0 : index
    %139 = vector.load %arg3[%c0_6, %c0_7, %c0_8] : memref<28x24x112xf32, #tpu.memory_space<vmem>>, vector<1x24x112xf32>
    %140 = vector.shape_cast %139 : vector<1x24x112xf32> to vector<24x112xf32>
    %cst_9 = arith.constant dense<0.000000e+00> : vector<1x112xf32>
    %141 = tpu.matmul %138, %140, %cst_9 {dimension_numbers = #tpu.dot_dimension_numbers<[1], [0], [0], [1], [0, 0, 1, 1], [], []>} : vector<1x24xf32>, vector<24x112xf32>, vector<1x112xf32> -> vector<1x112xf32>
    %142 = arith.addf %137, %141 : vector<1x112xf32>
    %143 = vector.extract_strided_slice %136 {offsets = [1, 0], sizes = [1, 24], strides = [1, 1]} : vector<28x24xf32> to vector<1x24xf32>
    %c1_10 = arith.constant 1 : index
    %c0_11 = arith.constant 0 : index
    %c0_12 = arith.constant 0 : index
    %144 = vector.load %arg3[%c1_10, %c0_11, %c0_12] : memref<28x24x112xf32, #tpu.memory_space<vmem>>, vector<1x24x112xf32>
    %145 = vector.shape_cast %144 : vector<1x24x112xf32> to vector<24x112xf32>
    %cst_13 = arith.constant dense<0.000000e+00> : vector<1x112xf32>
    %146 = tpu.matmul %143, %145, %cst_13 {dimension_numbers = #tpu.dot_dimension_numbers<[1], [0], [0], [1], [0, 0, 1, 1], [], []>} : vector<1x24xf32>, vector<24x112xf32>, vector<1x112xf32> -> vector<1x112xf32>
    %147 = arith.addf %142, %146 : vector<1x112xf32>
    %148 = vector.extract_strided_slice %136 {offsets = [2, 0], sizes = [1, 24], strides = [1, 1]} : vector<28x24xf32> to vector<1x24xf32>
    %c2_14 = arith.constant 2 : index
    %c0_15 = arith.constant 0 : index
    %c0_16 = arith.constant 0 : index
    %149 = vector.load %arg3[%c2_14, %c0_15, %c0_16] : memref<28x24x112xf32, #tpu.memory_space<vmem>>, vector<1x24x112xf32>
    %150 = vector.shape_cast %149 : vector<1x24x112xf32> to vector<24x112xf32>
    %cst_17 = arith.constant dense<0.000000e+00> : vector<1x112xf32>
    %151 = tpu.matmul %148, %150, %cst_17 {dimension_numbers = #tpu.dot_dimension_numbers<[1], [0], [0], [1], [0, 0, 1, 1], [], []>} : vector<1x24xf32>, vector<24x112xf32>, vector<1x112xf32> -> vector<1x112xf32>
    %152 = arith.addf %147, %151 : vector<1x112xf32>
    %153 = vector.extract_strided_slice %136 {offsets = [3, 0], sizes = [1, 24], strides = [1, 1]} : vector<28x24xf32> to vector<1x24xf32>
    %c3_18 = arith.constant 3 : index
    %c0_19 = arith.constant 0 : index
    %c0_20 = arith.constant 0 : index
    %154 = vector.load %arg3[%c3_18, %c0_19, %c0_20] : memref<28x24x112xf32, #tpu.memory_space<vmem>>, vector<1x24x112xf32>
    %155 = vector.shape_cast %154 : vector<1x24x112xf32> to vector<24x112xf32>
    %cst_21 = arith.constant dense<0.000000e+00> : vector<1x112xf32>
    %156 = tpu.matmul %153, %155, %cst_21 {dimension_numbers = #tpu.dot_dimension_numbers<[1], [0], [0], [1], [0, 0, 1, 1], [], []>} : vector<1x24xf32>, vector<24x112xf32>, vector<1x112xf32> -> vector<1x112xf32>
    %157 = arith.addf %152, %156 : vector<1x112xf32>
    %158 = vector.extract_strided_slice %136 {offsets = [4, 0], sizes = [1, 24], strides = [1, 1]} : vector<28x24xf32> to vector<1x24xf32>
    %c4_22 = arith.constant 4 : index
    %c0_23 = arith.constant 0 : index
    %c0_24 = arith.constant 0 : index
    %159 = vector.load %arg3[%c4_22, %c0_23, %c0_24] : memref<28x24x112xf32, #tpu.memory_space<vmem>>, vector<1x24x112xf32>
    %160 = vector.shape_cast %159 : vector<1x24x112xf32> to vector<24x112xf32>
    %cst_25 = arith.constant dense<0.000000e+00> : vector<1x112xf32>
    %161 = tpu.matmul %158, %160, %cst_25 {dimension_numbers = #tpu.dot_dimension_numbers<[1], [0], [0], [1], [0, 0, 1, 1], [], []>} : vector<1x24xf32>, vector<24x112xf32>, vector<1x112xf32> -> vector<1x112xf32>
    %162 = arith.addf %157, %161 : vector<1x112xf32>
    %163 = vector.extract_strided_slice %136 {offsets = [5, 0], sizes = [1, 24], strides = [1, 1]} : vector<28x24xf32> to vector<1x24xf32>
    %c5_26 = arith.constant 5 : index
    %c0_27 = arith.constant 0 : index
    %c0_28 = arith.constant 0 : index
    %164 = vector.load %arg3[%c5_26, %c0_27, %c0_28] : memref<28x24x112xf32, #tpu.memory_space<vmem>>, vector<1x24x112xf32>
    %165 = vector.shape_cast %164 : vector<1x24x112xf32> to vector<24x112xf32>
    %cst_29 = arith.constant dense<0.000000e+00> : vector<1x112xf32>
    %166 = tpu.matmul %163, %165, %cst_29 {dimension_numbers = #tpu.dot_dimension_numbers<[1], [0], [0], [1], [0, 0, 1, 1], [], []>} : vector<1x24xf32>, vector<24x112xf32>, vector<1x112xf32> -> vector<1x112xf32>
    %167 = arith.addf %162, %166 : vector<1x112xf32>
    %168 = vector.extract_strided_slice %136 {offsets = [6, 0], sizes = [1, 24], strides = [1, 1]} : vector<28x24xf32> to vector<1x24xf32>
    %c6_30 = arith.constant 6 : index
    %c0_31 = arith.constant 0 : index
    %c0_32 = arith.constant 0 : index
    %169 = vector.load %arg3[%c6_30, %c0_31, %c0_32] : memref<28x24x112xf32, #tpu.memory_space<vmem>>, vector<1x24x112xf32>
    %170 = vector.shape_cast %169 : vector<1x24x112xf32> to vector<24x112xf32>
    %cst_33 = arith.constant dense<0.000000e+00> : vector<1x112xf32>
    %171 = tpu.matmul %168, %170, %cst_33 {dimension_numbers = #tpu.dot_dimension_numbers<[1], [0], [0], [1], [0, 0, 1, 1], [], []>} : vector<1x24xf32>, vector<24x112xf32>, vector<1x112xf32> -> vector<1x112xf32>
    %172 = arith.addf %167, %171 : vector<1x112xf32>
    %173 = vector.extract_strided_slice %136 {offsets = [7, 0], sizes = [1, 24], strides = [1, 1]} : vector<28x24xf32> to vector<1x24xf32>
    %c7_34 = arith.constant 7 : index
    %c0_35 = arith.constant 0 : index
    %c0_36 = arith.constant 0 : index
    %174 = vector.load %arg3[%c7_34, %c0_35, %c0_36] : memref<28x24x112xf32, #tpu.memory_space<vmem>>, vector<1x24x112xf32>
    %175 = vector.shape_cast %174 : vector<1x24x112xf32> to vector<24x112xf32>
    %cst_37 = arith.constant dense<0.000000e+00> : vector<1x112xf32>
    %176 = tpu.matmul %173, %175, %cst_37 {dimension_numbers = #tpu.dot_dimension_numbers<[1], [0], [0], [1], [0, 0, 1, 1], [], []>} : vector<1x24xf32>, vector<24x112xf32>, vector<1x112xf32> -> vector<1x112xf32>
    %177 = arith.addf %172, %176 : vector<1x112xf32>
    %178 = vector.extract_strided_slice %136 {offsets = [8, 0], sizes = [1, 24], strides = [1, 1]} : vector<28x24xf32> to vector<1x24xf32>
    %c8_38 = arith.constant 8 : index
    %c0_39 = arith.constant 0 : index
    %c0_40 = arith.constant 0 : index
    %179 = vector.load %arg3[%c8_38, %c0_39, %c0_40] : memref<28x24x112xf32, #tpu.memory_space<vmem>>, vector<1x24x112xf32>
    %180 = vector.shape_cast %179 : vector<1x24x112xf32> to vector<24x112xf32>
    %cst_41 = arith.constant dense<0.000000e+00> : vector<1x112xf32>
    %181 = tpu.matmul %178, %180, %cst_41 {dimension_numbers = #tpu.dot_dimension_numbers<[1], [0], [0], [1], [0, 0, 1, 1], [], []>} : vector<1x24xf32>, vector<24x112xf32>, vector<1x112xf32> -> vector<1x112xf32>
    %182 = arith.addf %177, %181 : vector<1x112xf32>
    %183 = vector.extract_strided_slice %136 {offsets = [9, 0], sizes = [1, 24], strides = [1, 1]} : vector<28x24xf32> to vector<1x24xf32>
    %c9_42 = arith.constant 9 : index
    %c0_43 = arith.constant 0 : index
    %c0_44 = arith.constant 0 : index
    %184 = vector.load %arg3[%c9_42, %c0_43, %c0_44] : memref<28x24x112xf32, #tpu.memory_space<vmem>>, vector<1x24x112xf32>
    %185 = vector.shape_cast %184 : vector<1x24x112xf32> to vector<24x112xf32>
    %cst_45 = arith.constant dense<0.000000e+00> : vector<1x112xf32>
    %186 = tpu.matmul %183, %185, %cst_45 {dimension_numbers = #tpu.dot_dimension_numbers<[1], [0], [0], [1], [0, 0, 1, 1], [], []>} : vector<1x24xf32>, vector<24x112xf32>, vector<1x112xf32> -> vector<1x112xf32>
    %187 = arith.addf %182, %186 : vector<1x112xf32>
    %188 = vector.extract_strided_slice %136 {offsets = [10, 0], sizes = [1, 24], strides = [1, 1]} : vector<28x24xf32> to vector<1x24xf32>
    %c10_46 = arith.constant 10 : index
    %c0_47 = arith.constant 0 : index
    %c0_48 = arith.constant 0 : index
    %189 = vector.load %arg3[%c10_46, %c0_47, %c0_48] : memref<28x24x112xf32, #tpu.memory_space<vmem>>, vector<1x24x112xf32>
    %190 = vector.shape_cast %189 : vector<1x24x112xf32> to vector<24x112xf32>
    %cst_49 = arith.constant dense<0.000000e+00> : vector<1x112xf32>
    %191 = tpu.matmul %188, %190, %cst_49 {dimension_numbers = #tpu.dot_dimension_numbers<[1], [0], [0], [1], [0, 0, 1, 1], [], []>} : vector<1x24xf32>, vector<24x112xf32>, vector<1x112xf32> -> vector<1x112xf32>
    %192 = arith.addf %187, %191 : vector<1x112xf32>
    %193 = vector.extract_strided_slice %136 {offsets = [11, 0], sizes = [1, 24], strides = [1, 1]} : vector<28x24xf32> to vector<1x24xf32>
    %c11_50 = arith.constant 11 : index
    %c0_51 = arith.constant 0 : index
    %c0_52 = arith.constant 0 : index
    %194 = vector.load %arg3[%c11_50, %c0_51, %c0_52] : memref<28x24x112xf32, #tpu.memory_space<vmem>>, vector<1x24x112xf32>
    %195 = vector.shape_cast %194 : vector<1x24x112xf32> to vector<24x112xf32>
    %cst_53 = arith.constant dense<0.000000e+00> : vector<1x112xf32>
    %196 = tpu.matmul %193, %195, %cst_53 {dimension_numbers = #tpu.dot_dimension_numbers<[1], [0], [0], [1], [0, 0, 1, 1], [], []>} : vector<1x24xf32>, vector<24x112xf32>, vector<1x112xf32> -> vector<1x112xf32>
    %197 = arith.addf %192, %196 : vector<1x112xf32>
    %198 = vector.extract_strided_slice %136 {offsets = [12, 0], sizes = [1, 24], strides = [1, 1]} : vector<28x24xf32> to vector<1x24xf32>
    %c12_54 = arith.constant 12 : index
    %c0_55 = arith.constant 0 : index
    %c0_56 = arith.constant 0 : index
    %199 = vector.load %arg3[%c12_54, %c0_55, %c0_56] : memref<28x24x112xf32, #tpu.memory_space<vmem>>, vector<1x24x112xf32>
    %200 = vector.shape_cast %199 : vector<1x24x112xf32> to vector<24x112xf32>
    %cst_57 = arith.constant dense<0.000000e+00> : vector<1x112xf32>
    %201 = tpu.matmul %198, %200, %cst_57 {dimension_numbers = #tpu.dot_dimension_numbers<[1], [0], [0], [1], [0, 0, 1, 1], [], []>} : vector<1x24xf32>, vector<24x112xf32>, vector<1x112xf32> -> vector<1x112xf32>
    %202 = arith.addf %197, %201 : vector<1x112xf32>
    %203 = vector.extract_strided_slice %136 {offsets = [13, 0], sizes = [1, 24], strides = [1, 1]} : vector<28x24xf32> to vector<1x24xf32>
    %c13_58 = arith.constant 13 : index
    %c0_59 = arith.constant 0 : index
    %c0_60 = arith.constant 0 : index
    %204 = vector.load %arg3[%c13_58, %c0_59, %c0_60] : memref<28x24x112xf32, #tpu.memory_space<vmem>>, vector<1x24x112xf32>
    %205 = vector.shape_cast %204 : vector<1x24x112xf32> to vector<24x112xf32>
    %cst_61 = arith.constant dense<0.000000e+00> : vector<1x112xf32>
    %206 = tpu.matmul %203, %205, %cst_61 {dimension_numbers = #tpu.dot_dimension_numbers<[1], [0], [0], [1], [0, 0, 1, 1], [], []>} : vector<1x24xf32>, vector<24x112xf32>, vector<1x112xf32> -> vector<1x112xf32>
    %207 = arith.addf %202, %206 : vector<1x112xf32>
    %208 = vector.extract_strided_slice %136 {offsets = [14, 0], sizes = [1, 24], strides = [1, 1]} : vector<28x24xf32> to vector<1x24xf32>
    %c14_62 = arith.constant 14 : index
    %c0_63 = arith.constant 0 : index
    %c0_64 = arith.constant 0 : index
    %209 = vector.load %arg3[%c14_62, %c0_63, %c0_64] : memref<28x24x112xf32, #tpu.memory_space<vmem>>, vector<1x24x112xf32>
    %210 = vector.shape_cast %209 : vector<1x24x112xf32> to vector<24x112xf32>
    %cst_65 = arith.constant dense<0.000000e+00> : vector<1x112xf32>
    %211 = tpu.matmul %208, %210, %cst_65 {dimension_numbers = #tpu.dot_dimension_numbers<[1], [0], [0], [1], [0, 0, 1, 1], [], []>} : vector<1x24xf32>, vector<24x112xf32>, vector<1x112xf32> -> vector<1x112xf32>
    %212 = arith.addf %207, %211 : vector<1x112xf32>
    %213 = vector.extract_strided_slice %136 {offsets = [15, 0], sizes = [1, 24], strides = [1, 1]} : vector<28x24xf32> to vector<1x24xf32>
    %c15_66 = arith.constant 15 : index
    %c0_67 = arith.constant 0 : index
    %c0_68 = arith.constant 0 : index
    %214 = vector.load %arg3[%c15_66, %c0_67, %c0_68] : memref<28x24x112xf32, #tpu.memory_space<vmem>>, vector<1x24x112xf32>
    %215 = vector.shape_cast %214 : vector<1x24x112xf32> to vector<24x112xf32>
    %cst_69 = arith.constant dense<0.000000e+00> : vector<1x112xf32>
    %216 = tpu.matmul %213, %215, %cst_69 {dimension_numbers = #tpu.dot_dimension_numbers<[1], [0], [0], [1], [0, 0, 1, 1], [], []>} : vector<1x24xf32>, vector<24x112xf32>, vector<1x112xf32> -> vector<1x112xf32>
    %217 = arith.addf %212, %216 : vector<1x112xf32>
    %218 = vector.extract_strided_slice %136 {offsets = [16, 0], sizes = [1, 24], strides = [1, 1]} : vector<28x24xf32> to vector<1x24xf32>
    %c16_70 = arith.constant 16 : index
    %c0_71 = arith.constant 0 : index
    %c0_72 = arith.constant 0 : index
    %219 = vector.load %arg3[%c16_70, %c0_71, %c0_72] : memref<28x24x112xf32, #tpu.memory_space<vmem>>, vector<1x24x112xf32>
    %220 = vector.shape_cast %219 : vector<1x24x112xf32> to vector<24x112xf32>
    %cst_73 = arith.constant dense<0.000000e+00> : vector<1x112xf32>
    %221 = tpu.matmul %218, %220, %cst_73 {dimension_numbers = #tpu.dot_dimension_numbers<[1], [0], [0], [1], [0, 0, 1, 1], [], []>} : vector<1x24xf32>, vector<24x112xf32>, vector<1x112xf32> -> vector<1x112xf32>
    %222 = arith.addf %217, %221 : vector<1x112xf32>
    %223 = vector.extract_strided_slice %136 {offsets = [17, 0], sizes = [1, 24], strides = [1, 1]} : vector<28x24xf32> to vector<1x24xf32>
    %c17_74 = arith.constant 17 : index
    %c0_75 = arith.constant 0 : index
    %c0_76 = arith.constant 0 : index
    %224 = vector.load %arg3[%c17_74, %c0_75, %c0_76] : memref<28x24x112xf32, #tpu.memory_space<vmem>>, vector<1x24x112xf32>
    %225 = vector.shape_cast %224 : vector<1x24x112xf32> to vector<24x112xf32>
    %cst_77 = arith.constant dense<0.000000e+00> : vector<1x112xf32>
    %226 = tpu.matmul %223, %225, %cst_77 {dimension_numbers = #tpu.dot_dimension_numbers<[1], [0], [0], [1], [0, 0, 1, 1], [], []>} : vector<1x24xf32>, vector<24x112xf32>, vector<1x112xf32> -> vector<1x112xf32>
    %227 = arith.addf %222, %226 : vector<1x112xf32>
    %228 = vector.extract_strided_slice %136 {offsets = [18, 0], sizes = [1, 24], strides = [1, 1]} : vector<28x24xf32> to vector<1x24xf32>
    %c18_78 = arith.constant 18 : index
    %c0_79 = arith.constant 0 : index
    %c0_80 = arith.constant 0 : index
    %229 = vector.load %arg3[%c18_78, %c0_79, %c0_80] : memref<28x24x112xf32, #tpu.memory_space<vmem>>, vector<1x24x112xf32>
    %230 = vector.shape_cast %229 : vector<1x24x112xf32> to vector<24x112xf32>
    %cst_81 = arith.constant dense<0.000000e+00> : vector<1x112xf32>
    %231 = tpu.matmul %228, %230, %cst_81 {dimension_numbers = #tpu.dot_dimension_numbers<[1], [0], [0], [1], [0, 0, 1, 1], [], []>} : vector<1x24xf32>, vector<24x112xf32>, vector<1x112xf32> -> vector<1x112xf32>
    %232 = arith.addf %227, %231 : vector<1x112xf32>
    %233 = vector.extract_strided_slice %136 {offsets = [19, 0], sizes = [1, 24], strides = [1, 1]} : vector<28x24xf32> to vector<1x24xf32>
    %c19_82 = arith.constant 19 : index
    %c0_83 = arith.constant 0 : index
    %c0_84 = arith.constant 0 : index
    %234 = vector.load %arg3[%c19_82, %c0_83, %c0_84] : memref<28x24x112xf32, #tpu.memory_space<vmem>>, vector<1x24x112xf32>
    %235 = vector.shape_cast %234 : vector<1x24x112xf32> to vector<24x112xf32>
    %cst_85 = arith.constant dense<0.000000e+00> : vector<1x112xf32>
    %236 = tpu.matmul %233, %235, %cst_85 {dimension_numbers = #tpu.dot_dimension_numbers<[1], [0], [0], [1], [0, 0, 1, 1], [], []>} : vector<1x24xf32>, vector<24x112xf32>, vector<1x112xf32> -> vector<1x112xf32>
    %237 = arith.addf %232, %236 : vector<1x112xf32>
    %238 = vector.extract_strided_slice %136 {offsets = [20, 0], sizes = [1, 24], strides = [1, 1]} : vector<28x24xf32> to vector<1x24xf32>
    %c20_86 = arith.constant 20 : index
    %c0_87 = arith.constant 0 : index
    %c0_88 = arith.constant 0 : index
    %239 = vector.load %arg3[%c20_86, %c0_87, %c0_88] : memref<28x24x112xf32, #tpu.memory_space<vmem>>, vector<1x24x112xf32>
    %240 = vector.shape_cast %239 : vector<1x24x112xf32> to vector<24x112xf32>
    %cst_89 = arith.constant dense<0.000000e+00> : vector<1x112xf32>
    %241 = tpu.matmul %238, %240, %cst_89 {dimension_numbers = #tpu.dot_dimension_numbers<[1], [0], [0], [1], [0, 0, 1, 1], [], []>} : vector<1x24xf32>, vector<24x112xf32>, vector<1x112xf32> -> vector<1x112xf32>
    %242 = arith.addf %237, %241 : vector<1x112xf32>
    %243 = vector.extract_strided_slice %136 {offsets = [21, 0], sizes = [1, 24], strides = [1, 1]} : vector<28x24xf32> to vector<1x24xf32>
    %c21_90 = arith.constant 21 : index
    %c0_91 = arith.constant 0 : index
    %c0_92 = arith.constant 0 : index
    %244 = vector.load %arg3[%c21_90, %c0_91, %c0_92] : memref<28x24x112xf32, #tpu.memory_space<vmem>>, vector<1x24x112xf32>
    %245 = vector.shape_cast %244 : vector<1x24x112xf32> to vector<24x112xf32>
    %cst_93 = arith.constant dense<0.000000e+00> : vector<1x112xf32>
    %246 = tpu.matmul %243, %245, %cst_93 {dimension_numbers = #tpu.dot_dimension_numbers<[1], [0], [0], [1], [0, 0, 1, 1], [], []>} : vector<1x24xf32>, vector<24x112xf32>, vector<1x112xf32> -> vector<1x112xf32>
    %247 = arith.addf %242, %246 : vector<1x112xf32>
    %248 = vector.extract_strided_slice %136 {offsets = [22, 0], sizes = [1, 24], strides = [1, 1]} : vector<28x24xf32> to vector<1x24xf32>
    %c22_94 = arith.constant 22 : index
    %c0_95 = arith.constant 0 : index
    %c0_96 = arith.constant 0 : index
    %249 = vector.load %arg3[%c22_94, %c0_95, %c0_96] : memref<28x24x112xf32, #tpu.memory_space<vmem>>, vector<1x24x112xf32>
    %250 = vector.shape_cast %249 : vector<1x24x112xf32> to vector<24x112xf32>
    %cst_97 = arith.constant dense<0.000000e+00> : vector<1x112xf32>
    %251 = tpu.matmul %248, %250, %cst_97 {dimension_numbers = #tpu.dot_dimension_numbers<[1], [0], [0], [1], [0, 0, 1, 1], [], []>} : vector<1x24xf32>, vector<24x112xf32>, vector<1x112xf32> -> vector<1x112xf32>
    %252 = arith.addf %247, %251 : vector<1x112xf32>
    %253 = vector.extract_strided_slice %136 {offsets = [23, 0], sizes = [1, 24], strides = [1, 1]} : vector<28x24xf32> to vector<1x24xf32>
    %c23_98 = arith.constant 23 : index
    %c0_99 = arith.constant 0 : index
    %c0_100 = arith.constant 0 : index
    %254 = vector.load %arg3[%c23_98, %c0_99, %c0_100] : memref<28x24x112xf32, #tpu.memory_space<vmem>>, vector<1x24x112xf32>
    %255 = vector.shape_cast %254 : vector<1x24x112xf32> to vector<24x112xf32>
    %cst_101 = arith.constant dense<0.000000e+00> : vector<1x112xf32>
    %256 = tpu.matmul %253, %255, %cst_101 {dimension_numbers = #tpu.dot_dimension_numbers<[1], [0], [0], [1], [0, 0, 1, 1], [], []>} : vector<1x24xf32>, vector<24x112xf32>, vector<1x112xf32> -> vector<1x112xf32>
    %257 = arith.addf %252, %256 : vector<1x112xf32>
    %258 = vector.extract_strided_slice %136 {offsets = [24, 0], sizes = [1, 24], strides = [1, 1]} : vector<28x24xf32> to vector<1x24xf32>
    %c24_102 = arith.constant 24 : index
    %c0_103 = arith.constant 0 : index
    %c0_104 = arith.constant 0 : index
    %259 = vector.load %arg3[%c24_102, %c0_103, %c0_104] : memref<28x24x112xf32, #tpu.memory_space<vmem>>, vector<1x24x112xf32>
    %260 = vector.shape_cast %259 : vector<1x24x112xf32> to vector<24x112xf32>
    %cst_105 = arith.constant dense<0.000000e+00> : vector<1x112xf32>
    %261 = tpu.matmul %258, %260, %cst_105 {dimension_numbers = #tpu.dot_dimension_numbers<[1], [0], [0], [1], [0, 0, 1, 1], [], []>} : vector<1x24xf32>, vector<24x112xf32>, vector<1x112xf32> -> vector<1x112xf32>
    %262 = arith.addf %257, %261 : vector<1x112xf32>
    %263 = vector.extract_strided_slice %136 {offsets = [25, 0], sizes = [1, 24], strides = [1, 1]} : vector<28x24xf32> to vector<1x24xf32>
    %c25 = arith.constant 25 : index
    %c0_106 = arith.constant 0 : index
    %c0_107 = arith.constant 0 : index
    %264 = vector.load %arg3[%c25, %c0_106, %c0_107] : memref<28x24x112xf32, #tpu.memory_space<vmem>>, vector<1x24x112xf32>
    %265 = vector.shape_cast %264 : vector<1x24x112xf32> to vector<24x112xf32>
    %cst_108 = arith.constant dense<0.000000e+00> : vector<1x112xf32>
    %266 = tpu.matmul %263, %265, %cst_108 {dimension_numbers = #tpu.dot_dimension_numbers<[1], [0], [0], [1], [0, 0, 1, 1], [], []>} : vector<1x24xf32>, vector<24x112xf32>, vector<1x112xf32> -> vector<1x112xf32>
    %267 = arith.addf %262, %266 : vector<1x112xf32>
    %268 = vector.extract_strided_slice %136 {offsets = [26, 0], sizes = [1, 24], strides = [1, 1]} : vector<28x24xf32> to vector<1x24xf32>
    %c26 = arith.constant 26 : index
    %c0_109 = arith.constant 0 : index
    %c0_110 = arith.constant 0 : index
    %269 = vector.load %arg3[%c26, %c0_109, %c0_110] : memref<28x24x112xf32, #tpu.memory_space<vmem>>, vector<1x24x112xf32>
    %270 = vector.shape_cast %269 : vector<1x24x112xf32> to vector<24x112xf32>
    %cst_111 = arith.constant dense<0.000000e+00> : vector<1x112xf32>
    %271 = tpu.matmul %268, %270, %cst_111 {dimension_numbers = #tpu.dot_dimension_numbers<[1], [0], [0], [1], [0, 0, 1, 1], [], []>} : vector<1x24xf32>, vector<24x112xf32>, vector<1x112xf32> -> vector<1x112xf32>
    %272 = arith.addf %267, %271 : vector<1x112xf32>
    %273 = vector.extract_strided_slice %136 {offsets = [27, 0], sizes = [1, 24], strides = [1, 1]} : vector<28x24xf32> to vector<1x24xf32>
    %c27 = arith.constant 27 : index
    %c0_112 = arith.constant 0 : index
    %c0_113 = arith.constant 0 : index
    %274 = vector.load %arg3[%c27, %c0_112, %c0_113] : memref<28x24x112xf32, #tpu.memory_space<vmem>>, vector<1x24x112xf32>
    %275 = vector.shape_cast %274 : vector<1x24x112xf32> to vector<24x112xf32>
    %cst_114 = arith.constant dense<0.000000e+00> : vector<1x112xf32>
    %276 = tpu.matmul %273, %275, %cst_114 {dimension_numbers = #tpu.dot_dimension_numbers<[1], [0], [0], [1], [0, 0, 1, 1], [], []>} : vector<1x24xf32>, vector<24x112xf32>, vector<1x112xf32> -> vector<1x112xf32>
    %277 = arith.addf %272, %276 : vector<1x112xf32>
    %cst_115 = arith.constant 0.000000e+00 : f32
    %278 = vector.broadcast %cst_115 : f32 to vector<1x112xf32>
    %279 = arith.maximumf %277, %278 : vector<1x112xf32>
    %c0_116 = arith.constant 0 : index
    %c0_117 = arith.constant 0 : index
    %280 = vector.load %arg14[%c0_116, %c0_117] : memref<1x112xf32, #tpu.memory_space<vmem>>, vector<1x112xf32>
    tpu.vector_store %arg14[%c0_116, %c0_117], %279 {strides = array<i32>} : memref<1x112xf32, #tpu.memory_space<vmem>>, vector<1x112xf32>,
    %c0_118 = arith.constant 0 : index
    %c0_119 = arith.constant 0 : index
    %281 = vector.load %arg5[%c0_118, %c0_119] : memref<112x28xf32, #tpu.memory_space<vmem>>, vector<112x28xf32>
    %cst_120 = arith.constant dense<0.000000e+00> : vector<1x28xf32>
    %282 = tpu.matmul %279, %281, %cst_120 {dimension_numbers = #tpu.dot_dimension_numbers<[1], [0], [0], [1], [0, 0, 1, 1], [], []>} : vector<1x112xf32>, vector<112x28xf32>, vector<1x28xf32> -> vector<1x28xf32>
    %c0_121 = arith.constant 0 : index
    %c0_122 = arith.constant 0 : index
    %283 = vector.load %arg6[%c0_121, %c0_122] : memref<1x28xf32, #tpu.memory_space<vmem>>, vector<1x28xf32>
    %284 = arith.addf %282, %283 : vector<1x28xf32>
    %cst_123 = arith.constant 0.000000e+00 : f32
    %285 = vector.broadcast %cst_123 : f32 to vector<1x28xf32>
    %286 = arith.maximumf %284, %285 : vector<1x28xf32>
    %c0_124 = arith.constant 0 : index
    %c0_125 = arith.constant 0 : index
    %287 = vector.load %arg7[%c0_124, %c0_125] : memref<28x32xf32, #tpu.memory_space<vmem>>, vector<28x32xf32>
    %cst_126 = arith.constant dense<0.000000e+00> : vector<1x32xf32>
    %288 = tpu.matmul %286, %287, %cst_126 {dimension_numbers = #tpu.dot_dimension_numbers<[1], [0], [0], [1], [0, 0, 1, 1], [], []>} : vector<1x28xf32>, vector<28x32xf32>, vector<1x32xf32> -> vector<1x32xf32>
    %c0_127 = arith.constant 0 : index
    %c0_128 = arith.constant 0 : index
    %289 = vector.load %arg8[%c0_127, %c0_128] : memref<1x32xf32, #tpu.memory_space<vmem>>, vector<1x32xf32>
    %290 = arith.addf %288, %289 : vector<1x32xf32>
    %cst_129 = arith.constant 0.000000e+00 : f32
    %291 = vector.broadcast %cst_129 : f32 to vector<1x32xf32>
    %292 = arith.maximumf %290, %291 : vector<1x32xf32>
    %c0_130 = arith.constant 0 : index
    %c0_131 = arith.constant 0 : index
    %293 = vector.load %arg9[%c0_130, %c0_131] : memref<32x64xf32, #tpu.memory_space<vmem>>, vector<32x64xf32>
    %cst_132 = arith.constant dense<0.000000e+00> : vector<1x64xf32>
    %294 = tpu.matmul %292, %293, %cst_132 {dimension_numbers = #tpu.dot_dimension_numbers<[1], [0], [0], [1], [0, 0, 1, 1], [], []>} : vector<1x32xf32>, vector<32x64xf32>, vector<1x64xf32> -> vector<1x64xf32>
    %c0_133 = arith.constant 0 : index
    %c0_134 = arith.constant 0 : index
    %295 = vector.load %arg10[%c0_133, %c0_134] : memref<1x64xf32, #tpu.memory_space<vmem>>, vector<1x64xf32>
    %296 = arith.addf %294, %295 : vector<1x64xf32>
    %cst_135 = arith.constant 0.000000e+00 : f32
    %297 = vector.broadcast %cst_135 : f32 to vector<1x64xf32>
    %298 = arith.maximumf %296, %297 : vector<1x64xf32>
    %c0_136 = arith.constant 0 : index
    %c0_137 = arith.constant 0 : index
    %299 = vector.load %arg11[%c0_136, %c0_137] : memref<64x10xf32, #tpu.memory_space<vmem>>, vector<64x10xf32>
    %cst_138 = arith.constant dense<0.000000e+00> : vector<1x10xf32>
    %300 = tpu.matmul %298, %299, %cst_138 {dimension_numbers = #tpu.dot_dimension_numbers<[1], [0], [0], [1], [0, 0, 1, 1], [], []>} : vector<1x64xf32>, vector<64x10xf32>, vector<1x10xf32> -> vector<1x10xf32>
    %c0_139 = arith.constant 0 : index
    %c0_140 = arith.constant 0 : index
    %301 = vector.load %arg12[%c0_139, %c0_140] : memref<1x10xf32, #tpu.memory_space<vmem>>, vector<1x10xf32>
    %302 = arith.addf %300, %301 : vector<1x10xf32>
    %c0_141 = arith.constant 0 : index
    %c0_142 = arith.constant 0 : index
    %303 = vector.load %arg13[%c0_141, %c0_142] : memref<1x10xf32, #tpu.memory_space<vmem>>, vector<1x10xf32>
    tpu.vector_store %arg13[%c0_141, %c0_142], %302 {strides = array<i32>} : memref<1x10xf32, #tpu.memory_space<vmem>>, vector<1x10xf32>,
    return
  }
}

</mosaic_0001>

<bundles_post_ra>
// kernel: estagio_ii_forward.1
= control target key start
LH: loop header
LB: loop body
LE: loop exit
PB: predicated region body
PF: predicated region fallthrough
CT: control target
= control target key end

     0   :  { %21 = vsyncpa [#allocation6], 0  ;;  %s3064_s0 = inlined_call_operand.vmem [shape: f32[32,28], index: 0, kind: input, shape index: {}]   ;;  %s3065_s1 = inlined_call_operand.vmem [shape: f32[25], index: 1, kind: input, shape index: {}]   ;;  %s3066_s2 = inlined_call_operand.<no memory space> [shape: f32[1], index: 2, kind: input, shape index: {}]   ;;  %s3067_s3 = inlined_call_operand.hbm [shape: f32[28,24,112], index: 3, kind: input, shape index: {}]   ;;  %s3068_s4 = inlined_call_operand.vmem [shape: f32[1,112], index: 4, kind: input, shape index: {}]   ;;  %s3069_s5 = inlined_call_operand.vmem [shape: f32[112,28], index: 5, kind: input, shape index: {}]   ;;  %s3070_s6 = inlined_call_operand.vmem [shape: f32[1,28], index: 6, kind: input, shape index: {}]   ;;  %s3071_s7 = inlined_call_operand.vmem [shape: f32[28,32], index: 7, kind: input, shape index: {}]   ;;  %s3072_s8 = inlined_call_operand.vmem [shape: f32[1,32], index: 8, kind: input, shape index: {}]   ;;  %s3073_s9 = inlined_call_operand.vmem [shape: f32[32,64], index: 9, kind: input, shape index: {}]   ;;  %s3074_s10 = inlined_call_operand.vmem [shape: f32[1,64], index: 10, kind: input, shape index: {}]   ;;  %s3075_s11 = inlined_call_operand.vmem [shape: f32[64,10], index: 11, kind: input, shape index: {}]   ;;  %s3076_s12 = inlined_call_operand.vmem [shape: f32[1,10], index: 12, kind: input, shape index: {}]   ;;  %s3077_s13 = inlined_call_operand.hbm [shape: f32[1,10], index: 13, kind: output, shape index: {0}]   ;;  %s3078_s14 = inlined_call_operand.vmem [shape: f32[1,112], index: 14, kind: output, shape index: {1}]  }
   0x1   :  { %22 = vsyncpa [#allocation4], 0 }
   0x2   :  { %23 = vsyncpa [#allocation5], 0  ;;  %s31_s15 = sshll.u32 %s3065_s1, 4  ;;  %s41_s18 = sshll.u32 %s3067_s3, 4  ;;  %s32_s15 = int_to_ptr.vmem [resolvable:$true] %s31_s15  ;;  %s42_s18 = int_to_ptr.hbm [resolvable:$true] %s41_s18 }
   0x3   :  { %s1917_s19 = smov [#allocation3]   ;;  %s1918_s20 = smov [#allocation7]  }
   0x4   :  { %34 = dma.vmem_to_smem %s32_s15, 16, %s1917_s19, [#allocation6]  }
   0x5   :  { %s43_s21 = sshll.u32 %s1918_s20, 4  ;;  %s1919_s22 = smov 128   ;;  %s44_s21 = int_to_ptr.vmem [resolvable:$true] %s43_s21 }
   0x6   :  { %s1920_s23 = smov 8  }
   0x7   :  { %49 = dma.hbm_to_vmem [thread:$0]  %s42_s18, 10752, %s44_s21, [#allocation4], %s1919_s22, %s1919_s22, %s1920_s23  }
   0x8   :  { %1911 = dma.done.wait [#allocation6], 16  }
   0x9   :  { %1912 = vsyncadd [#allocation6], 4294967280 }
   0xa   :  { %1913 = dma.done.wait [#allocation4], 10752  }
   0xb   :  { %1914 = vsyncadd [#allocation4], 4294956544 }
   0xc   :  { %76 = sfence }
   0xd   :  { %s1787_s1 = sld [smem:[#allocation3 + $0x3]]  ;;  %v2010_v0 = vld [vmem:[%s3064_s0] sm:$0xff]  ;;  %v2023_v5 = vld [vmem:[%s3064_s0 + $0x8] sm:$0xff]  ;;  %s1921_s18 = smov 125   ;;  %vm205_vm0 = vcmask 1046528   ;;  %vm363_vm1 = vcmask 1045504  }
   0xe   :  { %s1785_s24 = sld [smem:[#allocation3 + $0x1]]  ;;  %s1922_s19 = smov 127   ;;  %vm521_vm2 = vcmask 1044480   ;;  %vm679_vm3 = vcmask 1043456   ;;  %vm841_vm4 = vcmask 195584   ;;  %vm1623_vm5 = vcmask 909312  }
   0xf   :  { %s1788_s25 = sld [smem:[#allocation3 + $0x4]]  ;;  %s1923_s22 = smov 124   ;;  %vm1640_vm6 = vcmask 916480   ;;  %vm1670_vm7 = vcmask 228352   ;;  %vm1703_vm8 = vcmask 261120   ;;  %vm1737_vm9 = vcmask 523264  }
  0x10   :  { %s1786_s26 = sld [smem:[#allocation3 + $0x2]]  ;;  %s1924_s23 = smov 126   ;;  %vm1761_vm10 = vcmask 73728  }
  0x11   :  { %s1790_s28 = sld [smem:[#allocation3 + $0x6]] }
  0x12   :  { %s1793_s29 = sld [smem:[#allocation3 + $0x9]] }
  0x13   :  { %v2012_v1 = vstv %s1787_s1  ;;  %s1792_s30 = sld [smem:[#allocation3 + $0x8]] }
  0x14   :  { %v145_v2 = vmul.f32 %v2012_v1, %v2010_v0  ;;  %v2016_v3 = vstv %s1785_s24  ;;  %s1791_s15 = sld [smem:[#allocation3 + $0x7]] }
  0x15   :  { %v93_v4 = vmul.f32 %v2016_v3, %v2010_v0  ;;  %v2027_v6 = vstv %s1788_s25  ;;  %s1795_s20 = sld [smem:[#allocation3 + $0xb]]  ;;  %v94_v46 = vmul.f32 %v2016_v3, %v2023_v5 }
  0x16   :  { %153 = vrot.lane.b32.xlu1 %v145_v2, %s1921_s18  ;;  %v2031_v8 = vstv %s1786_s26  ;;  %s1796_s21 = sld [smem:[#allocation3 + $0xc]]  ;;  %v171_v13 = vmul.f32 %v2027_v6, %v2010_v0 }
  0x17   :  { %101 = vrot.lane.b32.xlu0 %v93_v4, %s1922_s19  ;;  %v2029_v7 = vstv %s1790_s28  ;;  %v119_v16 = vmul.f32 %v2031_v8, %v2010_v0  ;;  %s1797_s1 = sld [smem:[#allocation3 + $0xd]]  ;;  %v120_v60 = vmul.f32 %v2031_v8, %v2023_v5 }
  0x18   :  { %v223_v9 = vmul.f32 %v2029_v7, %v2010_v0  ;;  %v2037_v10 = vmul.f32 %v2029_v7, %v2023_v5  ;;  %v2039_v11 = vstv %s1793_s29  ;;  %s1798_s24 = sld [smem:[#allocation3 + $0xe]] }
  0x19   :  { %v2041_v12 = vstv %s1792_s30  ;;  %v322_v17 = vmul.f32 %v2039_v11, %v2010_v0  ;;  %v2052_v18 = vmul.f32 %v2039_v11, %v2023_v5  ;;  %s1800_s25 = sld [smem:[#allocation3 + $0x10]] }
  0x1a   :  { %v231_v14 = vrot.slane %v223_v9, 1  ;;  %v232_v15 = vrot.slane %v2037_v10, 1  ;;  %v2054_v19 = vstv %s1791_s15  ;;  %v289_v21 = vmul.f32 %v2041_v12, %v2010_v0  ;;  %s1801_s26 = sld [smem:[#allocation3 + $0x11]] }
  0x1b   :  { %v2063_v22 = vmul.f32 %v2041_v12, %v2023_v5  ;;  %v256_v23 = vmul.f32 %v2054_v19, %v2010_v0  ;;  %v2070_v24 = vmul.f32 %v2054_v19, %v2023_v5  ;;  %v330_v26 = vrot.slane %v322_v17, 1  ;;  %s1802_s27 = sld [smem:[#allocation3 + $0x12]] }
  0x1c   :  { %v233_v20 = vsel %vm205_vm0, %v231_v14, %v232_v15  ;;  %v331_v27 = vrot.slane %v2052_v18, 1  ;;  %v2076_v29 = vstv %s1795_s20  ;;  %v297_v30 = vrot.slane %v289_v21, 1  ;;  %v2165_v14 = vld [vmem:[%s3064_s0 + $0x10] sm:$0xff]  ;;  %s1803_s29 = sld [smem:[#allocation3 + $0x13]] }
  0x1d   :  { %238 = vrot.lane.b32.xlu2 %v233_v20, %s1922_s19  ;;  %v264_v25 = vrot.slane %v256_v23, 1  ;;  %v265_v28 = vrot.slane %v2070_v24, 1  ;;  %v298_v31 = vrot.slane %v2063_v22, 1  ;;  %v2079_v32 = vstv %s1796_s21  ;;  %s1805_s30 = sld [smem:[#allocation3 + $0x15]] }
  0x1e   :  { %179 = vrot.lane.b32.xlu1 %v171_v13, %s1923_s22  ;;  %v381_v34 = vmul.f32 %v2076_v29, %v2010_v0  ;;  %v2088_v35 = vmul.f32 %v2076_v29, %v2023_v5  ;;  %v332_v36 = vsel %vm205_vm0, %v330_v26, %v331_v27  ;;  %v414_v38 = vmul.f32 %v2079_v32, %v2010_v0  ;;  %s1806_s15 = sld [smem:[#allocation3 + $0x16]] }
  0x1f   :  { %127 = vrot.lane.b32.xlu0 %v119_v16, %s1924_s23  ;;  %v266_v33 = vsel %vm205_vm0, %v264_v25, %v265_v28  ;;  %v299_v37 = vsel %vm205_vm0, %v297_v30, %v298_v31  ;;  %v2100_v39 = vmul.f32 %v2079_v32, %v2023_v5  ;;  %v2106_v42 = vstv %s1797_s1  ;;  %s1807_s16 = sld [smem:[#allocation3 + $0x17]] }
  0x20   :  { %v389_v40 = vrot.slane %v381_v34, 2  ;;  %v390_v41 = vrot.slane %v2088_v35, 2  ;;  %v422_v43 = vrot.slane %v414_v38, 2  ;;  %v2109_v45 = vstv %s1798_s24  ;;  %s1808_s17 = sld [smem:[#allocation3 + $0x18]] }
  0x21   :  { %v423_v44 = vrot.slane %v2100_v39, 2  ;;  %v447_v48 = vmul.f32 %v2106_v42, %v2010_v0  ;;  %v2120_v49 = vmul.f32 %v2106_v42, %v2023_v5  ;;  %v480_v50 = vmul.f32 %v2109_v45, %v2010_v0  ;;  %s1789_s1 = sld [smem:[#allocation3 + $0x5]] }
  0x22   :  { %v391_v47 = vsel %vm363_vm1, %v389_v40, %v390_v41  ;;  %v2126_v51 = vmul.f32 %v2109_v45, %v2023_v5  ;;  %v2136_v57 = vstv %s1800_s25  ;;  %v2156_v4 = vstv %s1801_s26  ;;  %s1794_s24 = sld [smem:[#allocation3 + $0xa]] }
  0x23   :  { %v424_v52 = vsel %vm363_vm1, %v422_v43, %v423_v44  ;;  %v455_v53 = vrot.slane %v447_v48, 2  ;;  %v456_v54 = vrot.slane %v2120_v49, 2  ;;  %v488_v55 = vrot.slane %v480_v50, 2  ;;  %s1799_s25 = sld [smem:[#allocation3 + $0xf]] }
  0x24   :  { %v489_v56 = vrot.slane %v2126_v51, 2  ;;  %v539_v61 = vmul.f32 %v2136_v57, %v2010_v0  ;;  %v2150_v62 = vmul.f32 %v2136_v57, %v2023_v5  ;;  %v2158_v9 = vstv %s1802_s27  ;;  %s2710_s26 = sld [smem:[#allocation3 + $0x14]] }
  0x25   :  { %271 = vrot.lane.b32.xlu2 %v266_v33, %s1924_s23  ;;  %v457_v58 = vsel %vm363_vm1, %v455_v53, %v456_v54  ;;  %v146_v13 = vmul.f32 %v2012_v1, %v2023_v5  ;;  %v572_v16 = vmul.f32 %v2156_v4, %v2010_v0  ;;  %v2171_v17 = vmul.f32 %v2156_v4, %v2023_v5 }
  0x26   :  { %337 = vrot.lane.b32.xlu1 %v332_v36, %s1923_s22  ;;  %v490_v59 = vsel %vm363_vm1, %v488_v55, %v489_v56  ;;  %v547_v63 = vrot.slane %v539_v61, 3  ;;  %v548_v2 = vrot.slane %v2150_v62, 3  ;;  %v172_v21 = vmul.f32 %v2027_v6, %v2023_v5 }
  0x27   :  { %304 = vrot.lane.b32.xlu0 %v299_v37, %s1921_s18  ;;  %v605_v23 = vmul.f32 %v2158_v9, %v2010_v0  ;;  %v2182_v25 = vmul.f32 %v2158_v9, %v2023_v5  ;;  %v2186_v26 = vmul.f32 %v2029_v7, %v2165_v14  ;;  %v580_v30 = vrot.slane %v572_v16, 3 }
  0x28   :  { %v549_v20 = vsel %vm521_vm2, %v547_v63, %v548_v2  ;;  %v581_v33 = vrot.slane %v2171_v17, 3  ;;  %v2194_v38 = vstv %s1803_s29  ;;  %v2201_v43 = vmul.f32 %v2054_v19, %v2165_v14 }
  0x29   :  { %v613_v34 = vrot.slane %v605_v23, 3  ;;  %v614_v36 = vrot.slane %v2182_v25, 3  ;;  %v234_v37 = vrot.slane %v2186_v26, 1  ;;  %v638_v50 = vmul.f32 %v2194_v38, %v2010_v0 }
  0x2a   :  { %v582_v40 = vsel %vm521_vm2, %v580_v30, %v581_v33  ;;  %v267_v53 = vrot.slane %v2201_v43, 1  ;;  %v2250_v24 = vmul.f32 %v2039_v11, %v2165_v14  ;;  %v95_v16 = vmul.f32 %v2016_v3, %v2165_v14 }
  0x2b   :  { %v235_v48 = vsel %vm205_vm0, %v232_v15, %v234_v37  ;;  %v646_v10 = vrot.slane %v638_v50, 3  ;;  %v121_v18 = vmul.f32 %v2031_v8, %v2165_v14  ;;  %v2287_v50 = vmul.f32 %v2076_v29, %v2165_v14 }
  0x2c   :  { %v2392_v26 = vmul.f32 %v2136_v57, %v2165_v14 }
  0x2d   :  { %396 = vrot.lane.b32.xlu2 %v391_v47, %s1922_s19  ;;  %v2208_v47 = vmul.f32 %v2041_v12, %v2165_v14 }
  0x2e   :  { %103 = vrot.lane.b32.xlu1 %v94_v46, %s1922_s19  ;;  %v615_v46 = vsel %vm521_vm2, %v613_v34, %v614_v36  ;;  %v550_v43 = vrot.slane %v2392_v26, 3 }
  0x2f   :  { %429 = vrot.lane.b32.xlu0 %v424_v52, %s1924_s23  ;;  %v2219_v52 = vmul.f32 %v2194_v38, %v2023_v5  ;;  %v300_v55 = vrot.slane %v2208_v47, 1 }
  0x31   :  { %v647_v15 = vrot.slane %v2219_v52, 3 }
  0x35   :  { %462 = vrot.lane.b32.xlu2 %v457_v58, %s1921_s18  ;;  %v2227_v58 = vstv %s1805_s30 }
  0x36   :  { %495 = vrot.lane.b32.xlu1 %v490_v59, %s1923_s22  ;;  %v268_v59 = vsel %vm205_vm0, %v265_v28, %v267_v53  ;;  %v697_v61 = vmul.f32 %v2227_v58, %v2010_v0  ;;  %v2243_v63 = vmul.f32 %v2227_v58, %v2023_v5 }
  0x37   :  { %129 = vrot.lane.b32.xlu0 %v120_v60, %s1924_s23  ;;  %v301_v60 = vsel %vm205_vm0, %v298_v31, %v300_v55  ;;  %v333_v31 = vrot.slane %v2250_v24, 1 }
  0x38   :  { %v705_v22 = vrot.slane %v697_v61, 4  ;;  %v706_v28 = vrot.slane %v2243_v63, 4  ;;  %v392_v61 = vrot.slane %v2287_v50, 2 }
  0x39   :  { %v334_v23 = vsel %vm205_vm0, %v331_v27, %v333_v31  ;;  %v2281_v27 = vstv %s1807_s16 }
  0x3d   :  { %155 = vrot.lane.b32.xlu2 %v146_v13, %s1921_s18  ;;  %v648_v13 = vsel %vm521_vm2, %v646_v10, %v647_v15 }
  0x3e   :  { %554 = vrot.lane.b32.xlu1 %v549_v20, %s1922_s19  ;;  %v2259_v20 = vstv %s1806_s15 }
  0x3f   :  { %181 = vrot.lane.b32.xlu0 %v172_v21, %s1923_s22  ;;  %v707_v21 = vsel %vm679_vm3, %v705_v22, %v706_v28  ;;  %v730_v30 = vmul.f32 %v2259_v20, %v2010_v0  ;;  %v2273_v34 = vmul.f32 %v2259_v20, %v2023_v5 }
  0x45   :  { %587 = vrot.lane.b32.xlu2 %v582_v40, %s1924_s23  ;;  %v738_v40 = vrot.slane %v730_v30, 4  ;;  %v2314_v30 = vmul.f32 %v2079_v32, %v2165_v14 }
  0x46   :  { %620 = vrot.lane.b32.xlu1 %v615_v46, %s1921_s18  ;;  %v739_v46 = vrot.slane %v2273_v34, 4 }
  0x47   :  { %240 = vrot.lane.b32.xlu0 %v235_v48, %s1922_s19  ;;  %v147_v48 = vmul.f32 %v2012_v1, %v2165_v14 }
  0x48   :  { %v740_v10 = vsel %vm679_vm3, %v738_v40, %v739_v46  ;;  %v2318_v40 = vmul.f32 %v2106_v42, %v2165_v14 }
  0x4d   :  { %273 = vrot.lane.b32.xlu2 %v268_v59, %s1924_s23  ;;  %v763_v59 = vmul.f32 %v2281_v27, %v2010_v0 }
  0x4e   :  { %306 = vrot.lane.b32.xlu1 %v301_v60, %s1921_s18  ;;  %v2296_v60 = vmul.f32 %v2281_v27, %v2023_v5 }
  0x4f   :  { %653 = vrot.lane.b32.xlu0 %v648_v13, %s1923_s22  ;;  %v771_v13 = vrot.slane %v763_v59, 4 }
  0x50   :  { %v3079_v22 = vrot.slane %v2296_v60, 4 }
  0x55   :  { %105 = vrot.lane.b32.xlu2 %v95_v16, %s1922_s19  ;;  %v2303_v16 = vstv %s1808_s17 }
  0x56   :  { %712 = vrot.lane.b32.xlu1 %v707_v21, %s1922_s19  ;;  %v173_v21 = vmul.f32 %v2027_v6, %v2165_v14  ;;  %v2327_v35 = vmul.f32 %v2303_v16, %v2023_v5 }
  0x57   :  { %339 = vrot.lane.b32.xlu0 %v334_v23, %s1923_s22  ;;  %v393_v23 = vsel %vm363_vm1, %v390_v41, %v392_v61  ;;  %v425_v41 = vrot.slane %v2314_v30, 2 }
  0x5d   :  { %131 = vrot.lane.b32.xlu2 %v121_v18, %s1924_s23  ;;  %v773_v18 = vsel %vm679_vm3, %v771_v13, %v3079_v22  ;;  %v805_v13 = vrot.slane %v2327_v35, 4  ;;  %v2338_v22 = vld [vmem:[%s3064_s0 + $0x18] sm:$0xff]  ;;  %s81_s0 = sld [smem:[#allocation3]] }
  0x5e   :  { %157 = vrot.lane.b32.xlu1 %v147_v48, %s1921_s18  ;;  %v796_v48 = vmul.f32 %v2303_v16, %v2010_v0  ;;  %v96_v51 = vmul.f32 %v2016_v3, %v2338_v22  ;;  %v122_v62 = vmul.f32 %v2031_v8, %v2338_v22 }
  0x5f   :  { %745 = vrot.lane.b32.xlu0 %v740_v10, %s1924_s23  ;;  %v458_v10 = vrot.slane %v2318_v40, 2 }
  0x60   :  { %v804_v59 = vrot.slane %v796_v48, 4  ;;  %v2356_v48 = vmul.f32 %v2054_v19, %v2338_v22 }
  0x62   :  { %v806_v39 = vsel %vm679_vm3, %v804_v59, %v805_v13  ;;  %v269_v49 = vrot.slane %v2356_v48, 1  ;;  %v2378_v59 = vmul.f32 %v2041_v12, %v2338_v22  ;;  %v3084_v48 = vrot.slane %v2296_v60, 4 }
  0x64   :  { %v302_v12 = vrot.slane %v2378_v59, 1 }
  0x65   :  { %398 = vrot.lane.b32.xlu2 %v393_v23, %s1922_s19  ;;  %v2347_v23 = vmul.f32 %v2029_v7, %v2338_v22 }
  0x66   :  { %183 = vrot.lane.b32.xlu1 %v173_v21, %s1923_s22  ;;  %v426_v21 = vsel %vm363_vm1, %v423_v44, %v425_v41  ;;  %v2363_v44 = vmul.f32 %v2109_v45, %v2165_v14 }
  0x67   :  { %778 = vrot.lane.b32.xlu0 %v773_v18, %s1921_s18  ;;  %v459_v18 = vsel %vm363_vm1, %v456_v54, %v458_v10  ;;  %v236_v7 = vrot.slane %v2347_v23, 1 }
  0x68   :  { %v491_v19 = vrot.slane %v2363_v44, 2 }
  0x69   :  { %v237_v54 = vsel %vm205_vm0, %v234_v37, %v236_v7 }
  0x6d   :  { %431 = vrot.lane.b32.xlu2 %v426_v21, %s1924_s23  ;;  %v270_v21 = vsel %vm205_vm0, %v267_v53, %v269_v49  ;;  %v2410_v53 = vmul.f32 %v2039_v11, %v2338_v22 }
  0x6e   :  { %464 = vrot.lane.b32.xlu1 %v459_v18, %s1921_s18  ;;  %v492_v18 = vsel %vm363_vm1, %v489_v56, %v491_v19  ;;  %v303_v56 = vsel %vm205_vm0, %v300_v55, %v302_v12  ;;  %v2437_v55 = vmul.f32 %v2158_v9, %v2165_v14 }
  0x6f   :  { %811 = vrot.lane.b32.xlu0 %v806_v39, %s1923_s22  ;;  %v551_v39 = vsel %vm521_vm2, %v548_v2, %v550_v43  ;;  %v335_v3 = vrot.slane %v2410_v53, 1 }
  0x70   :  { %v3083_v24 = vrot.slane %v2437_v55, 3 }
  0x71   :  { %v336_v2 = vsel %vm205_vm0, %v333_v31, %v335_v3 }
  0x72   :  { %v617_v17 = vsel %vm521_vm2, %v614_v36, %v3083_v24  ;;  %v2478_v36 = vstv %s81_s0 }
  0x75   :  { %242 = vrot.lane.b32.xlu2 %v237_v54, %s1922_s19  ;;  %v2419_v54 = vmul.f32 %v2156_v4, %v2165_v14 }
  0x76   :  { %275 = vrot.lane.b32.xlu1 %v270_v21, %s1924_s23  ;;  %v2441_v21 = vmul.f32 %v2076_v29, %v2338_v22 }
  0x77   :  { %497 = vrot.lane.b32.xlu0 %v492_v18, %s1923_s22  ;;  %v2398_v37 = vpop.permute.xlu2 %238  ;;  %v583_v47 = vrot.slane %v2419_v54, 3 }
  0x78   :  { %v3080_v29 = vrot.slane %v2441_v21, 2 }
  0x79   :  { %v584_v8 = vsel %vm521_vm2, %v581_v33, %v583_v47  ;;  %v2462_v33 = vmul.f32 %v2194_v38, %v2165_v14 }
  0x7b   :  { %v3082_v25 = vrot.slane %v2462_v33, 3  ;;  %v3086_v53 = vrot.slane %v2462_v33, 3 }
  0x7d   :  { %308 = vrot.lane.b32.xlu2 %v303_v56, %s1921_s18  ;;  %v395_v56 = vsel %vm363_vm1, %v392_v61, %v3080_v29  ;;  %v2504_v29 = vmul.f32 %v2227_v58, %v2165_v14 }
  0x7e   :  { %107 = vrot.lane.b32.xlu1 %v96_v51, %s1922_s19 }
  0x7f   :  { %556 = vrot.lane.b32.xlu0 %v551_v39, %s1922_s19  ;;  %v2425_v11 = vpop.permute.xlu2 %271  ;;  %v148_v39 = vmul.f32 %v2012_v1, %v2338_v22 }
  0x85   :  { %341 = vrot.lane.b32.xlu2 %v336_v2, %s1923_s22 }
  0x86   :  { %133 = vrot.lane.b32.xlu1 %v122_v62, %s1924_s23  ;;  %v2473_v62 = vmul.f32 %v2079_v32, %v2338_v22  ;;  %v83_v32 = vmul.f32 %v2478_v36, %v2010_v0 }
  0x87   :  { %589 = vrot.lane.b32.xlu0 %v584_v8, %s1924_s23  ;;  %v2452_v31 = vpop.permute.xlu2 %396  ;;  %v650_v8 = vsel %vm521_vm2, %v647_v15, %v3082_v25 }
  0x88   :  { %v154_v18 = vpop.permute.xlu1 %153  ;;  %v3081_v61 = vrot.slane %v2473_v62, 2 }
  0x89   :  { %v102_v51 = vpop.permute.xlu0 %101 }
  0x8a   :  { %v113_v52 = vadd.f32 %v102_v51, %v83_v32 }
  0x8d   :  { %622 = vrot.lane.b32.xlu2 %v617_v17, %s1921_s18  ;;  %v2493_v17 = vmul.f32 %v2106_v42, %v2338_v22  ;;  %v2508_v42 = vstv %s1789_s1 }
  0x8e   :  { %400 = vrot.lane.b32.xlu1 %v395_v56, %s1922_s19  ;;  %v428_v56 = vsel %vm363_vm1, %v425_v41, %v3081_v61  ;;  %v197_v25 = vmul.f32 %v2508_v42, %v2010_v0  ;;  %v2519_v51 = vmul.f32 %v2508_v42, %v2023_v5 }
  0x8f   :  { %159 = vrot.lane.b32.xlu0 %v148_v39, %s1921_s18  ;;  %v2481_v50 = vpop.permute.xlu2 %462  ;;  %v174_v39 = vmul.f32 %v2027_v6, %v2338_v22  ;;  %v460_v15 = vrot.slane %v2493_v17, 2  ;;  %v708_v6 = vrot.slane %v2504_v29, 4 }
  0x90   :  { %v180_v1 = vpop.permute.xlu1 %179  ;;  %v206_v24 = vrot.slane %v197_v25, 1  ;;  %v207_v40 = vrot.slane %v2519_v51, 1 }
  0x91   :  { %v128_v2 = vpop.permute.xlu0 %127 }
  0x92   :  { %v139_v41 = vadd.f32 %v128_v2, %v113_v52  ;;  %v2528_v2 = vmul.f32 %v2109_v45, %v2338_v22  ;;  %v2537_v52 = vmul.f32 %v2259_v20, %v2165_v14  ;;  %v208_v25 = vsel %vm205_vm0, %v206_v24, %v207_v40 }
  0x93   :  { %v84_v24 = vmul.f32 %v2478_v36, %v2023_v5 }
  0x94   :  { %v493_v45 = vrot.slane %v2528_v2, 2 }
  0x95   :  { %655 = vrot.lane.b32.xlu2 %v650_v8, %s1923_s22  ;;  %v461_v8 = vsel %vm363_vm1, %v458_v10, %v460_v15 }
  0x96   :  { %433 = vrot.lane.b32.xlu1 %v428_v56, %s1924_s23  ;;  %v165_v56 = vadd.f32 %v154_v18, %v139_v41  ;;  %v741_v18 = vrot.slane %v2537_v52, 4  ;;  %v494_v23 = vsel %vm363_vm1, %v491_v19, %v493_v45 }
  0x97   :  { %185 = vrot.lane.b32.xlu0 %v174_v39, %s1923_s22  ;;  %v156_v30 = vpop.permute.xlu2 %155  ;;  %v709_v39 = vsel %vm679_vm3, %v706_v28, %v708_v6 }
  0x98   :  { %v2512_v61 = vpop.permute.xlu1 %337  ;;  %v191_v28 = vadd.f32 %v180_v1, %v165_v56  ;;  %v2563_v1 = vmul.f32 %v2136_v57, %v2338_v22  ;;  %v742_v44 = vsel %vm679_vm3, %v739_v46, %v741_v18  ;;  %v2582_v46 = vstv %s1794_s24 }
  0x99   :  { %v305_v32 = vpop.permute.xlu0 %304  ;;  %v355_v60 = vmul.f32 %v2582_v46, %v2010_v0 }
  0x9a   :  { %v217_v51 = vadd.f32 %v208_v25, %v191_v28 }
  0x9c   :  { %v250_v56 = vadd.f32 %v2398_v37, %v217_v51 }
  0x9d   :  { %466 = vrot.lane.b32.xlu2 %v461_v8, %s1921_s18  ;;  %v552_v8 = vrot.slane %v2563_v1, 3 }
  0x9e   :  { %244 = vrot.lane.b32.xlu1 %v236_v7, %s1922_s19  ;;  %v2559_v7 = vmul.f32 %v2281_v27, %v2165_v14  ;;  %v283_v51 = vadd.f32 %v2425_v11, %v250_v56  ;;  %v85_v56 = vmul.f32 %v2478_v36, %v2165_v14 }
  0x9f   :  { %714 = vrot.lane.b32.xlu0 %v709_v39, %s1922_s19  ;;  %v2546_v63 = vpop.permute.xlu2 %587  ;;  %v553_v37 = vsel %vm521_vm2, %v550_v43, %v552_v8 }
  0xa0   :  { %v104_v10 = vpop.permute.xlu1 %103  ;;  %v774_v19 = vrot.slane %v2559_v7, 4  ;;  %v316_v11 = vadd.f32 %v305_v32, %v283_v51  ;;  %v2642_v51 = vmul.f32 %v2194_v38, %v2338_v22  ;;  %v867_v7 = vld [vmem:[#allocation7 + $0x18] sm:$0xff] }
  0xa1   :  { %v2550_v41 = vpop.permute.xlu0 %429  ;;  %v114_v39 = vadd.f32 %v104_v10, %v84_v24  ;;  %v2600_v10 = vmul.f32 %v2156_v4, %v2338_v22 }
  0xa2   :  { %v651_v54 = vrot.slane %v2642_v51, 3 }
  0xa3   :  { %v585_v43 = vrot.slane %v2600_v10, 3 }
  0xa5   :  { %499 = vrot.lane.b32.xlu2 %v494_v23, %s1923_s22  ;;  %v2591_v23 = vmul.f32 %v2303_v16, %v2165_v14  ;;  %v586_v32 = vsel %vm521_vm2, %v583_v47, %v585_v43 }
  0xa6   :  { %277 = vrot.lane.b32.xlu1 %v269_v49, %s1924_s23  ;;  %v775_v49 = vsel %vm679_vm3, %v3084_v48, %v774_v19 }
  0xa7   :  { %747 = vrot.lane.b32.xlu0 %v742_v44, %s1924_s23  ;;  %v274_v57 = vpop.permute.xlu2 %273  ;;  %v2607_v44 = vmul.f32 %v2582_v46, %v2023_v5  ;;  %v807_v4 = vrot.slane %v2591_v23, 4 }
  0xa8   :  { %v2580_v28 = vpop.permute.xlu1 %495 }
  0xa9   :  { %v130_v34 = vpop.permute.xlu0 %129  ;;  %v808_v59 = vsel %vm679_vm3, %v805_v13, %v807_v4 }
  0xaa   :  { %v140_v25 = vadd.f32 %v130_v34, %v114_v39  ;;  %v2611_v39 = vmul.f32 %v2508_v42, %v2165_v14  ;;  %v364_v34 = vrot.slane %v355_v60, 2 }
  0xac   :  { %v166_v24 = vadd.f32 %v156_v30, %v140_v25  ;;  %v365_v25 = vrot.slane %v2607_v44, 2 }
  0xad   :  { %780 = vrot.lane.b32.xlu2 %v775_v49, %s1921_s18  ;;  %v209_v49 = vrot.slane %v2611_v39, 1 }
  0xae   :  { %558 = vrot.lane.b32.xlu1 %v553_v37, %s1922_s19  ;;  %v366_v35 = vsel %vm363_vm1, %v364_v34, %v365_v25  ;;  %v3085_v34 = vrot.slane %v2437_v55, 3  ;;  %v3087_v55 = vrot.slane %v2441_v21, 2 }
  0xaf   :  { %310 = vrot.lane.b32.xlu0 %v302_v12, %s1921_s18  ;;  %v106_v26 = vpop.permute.xlu2 %105  ;;  %v2633_v12 = vmul.f32 %v2158_v9, %v2338_v22  ;;  %v210_v9 = vsel %vm205_vm0, %v207_v40, %v209_v49 }
  0xb0   :  { %v2620_v30 = vpop.permute.xlu1 %554  ;;  %v115_v60 = vadd.f32 %v106_v26, %v85_v56 }
  0xb1   :  { %v182_v48 = vpop.permute.xlu0 %181  ;;  %v618_v13 = vrot.slane %v2633_v12, 3 }
  0xb2   :  { %v192_v37 = vadd.f32 %v182_v48, %v166_v24  ;;  %v349_v24 = vadd.f32 %v2512_v61, %v316_v11 }
  0xb3   :  { %v619_v48 = vsel %vm521_vm2, %v3085_v34, %v618_v13  ;;  %v925_v34 = vld [vmem:[#allocation7 + $0x58] sm:$0xff] }
  0xb4   :  { %v375_v47 = vadd.f32 %v366_v35, %v349_v24  ;;  %v218_v26 = vadd.f32 %v210_v9, %v192_v37  ;;  %v2680_v24 = vstv %s1799_s25  ;;  %942 = vmatpush.msra.mxu3 %v925_v34  ;;  %v2742_v34 = vstv %s2710_s26 }
  0xb5   :  { %813 = vrot.lane.b32.xlu2 %v808_v59, %s1923_s22  ;;  %v2674_v59 = vmul.f32 %v2227_v58, %v2338_v22  ;;  %v671_v52 = vmul.f32 %v2742_v34, %v2010_v0 }
  0xb6   :  { %591 = vrot.lane.b32.xlu1 %v586_v32, %s1924_s23  ;;  %v408_v37 = vadd.f32 %v2452_v31, %v375_v47  ;;  %v513_v31 = vmul.f32 %v2680_v24, %v2010_v0 }
  0xb7   :  { %343 = vrot.lane.b32.xlu0 %v335_v3, %s1923_s22  ;;  %v132_v38 = vpop.permute.xlu2 %131  ;;  %v652_v3 = vsel %vm521_vm2, %v3086_v53, %v651_v54  ;;  %v924_v53 = vld [vmem:[#allocation7 + $0x50] sm:$0xff] }
  0xb8   :  { %v2658_v61 = vpop.permute.xlu1 %620  ;;  %v2660_v11 = vadd.f32 %v132_v38, %v115_v60  ;;  %v710_v60 = vrot.slane %v2674_v59, 4  ;;  %v441_v58 = vadd.f32 %v2550_v41, %v408_v37  ;;  %v840_v38 = vld [vmem:[#allocation7 + $0x10] sm:$0xff]  ;;  %v2707_v41 = vmul.f32 %v2281_v27, %v2338_v22  ;;  %v838_v27 = vld [vmem:[#allocation7] sm:$0xff]  ;;  %943 = vmatpush.msra.mxu3 %v924_v53 }
  0xb9   :  { %v241_v40 = vpop.permute.xlu0 %240  ;;  %858 = vmatpush.msra.mxu1 %v840_v38  ;;  %v869_v38 = vld [vmem:[#allocation7 + $0x28] sm:$0xff]  ;;  %v2765_v53 = vmul.f32 %v2508_v42, %v2338_v22 }
  0xba   :  { %v251_v56 = vadd.f32 %v241_v40, %v218_v26  ;;  %v711_v21 = vsel %vm679_vm3, %v708_v6, %v710_v60  ;;  %v474_v47 = vadd.f32 %v2481_v50, %v441_v58  ;;  %v2714_v26 = vmul.f32 %v2259_v20, %v2338_v22  ;;  %v839_v40 = vld [vmem:[#allocation7 + $0x8] sm:$0xff]  ;;  %v896_v50 = vld [vmem:[#allocation7 + $0x38] sm:$0xff]  ;;  %v895_v58 = vld [vmem:[#allocation7 + $0x30] sm:$0xff] }
  0xbb   :  { %v3088_v6 = vrot.slane %v2473_v62, 2  ;;  %859 = vmatpush.msra.mxu1 %v839_v40  ;;  %v1037_v40 = vld [vmem:[#allocation7 + $0xb8] sm:$0xff] }
  0xbc   :  { %v2677_v32 = vadd.f32 %v274_v57, %v251_v56  ;;  %v2696_v57 = vmul.f32 %v2680_v24, %v2023_v5  ;;  %v897_v56 = vld [vmem:[#allocation7 + $0x40] sm:$0xff]  ;;  %v507_v37 = vadd.f32 %v2580_v28, %v474_v47  ;;  %v953_v28 = vld [vmem:[#allocation7 + $0x70] sm:$0xff] }
  0xbd   :  { %624 = vrot.lane.b32.xlu2 %v619_v48, %s1921_s18  ;;  %v522_v48 = vrot.slane %v513_v31, 3  ;;  %914 = vmatpush.msra.mxu2 %v897_v56  ;;  %v923_v31 = vld [vmem:[#allocation7 + $0x48] sm:$0xff] }
  0xbe   :  { %657 = vrot.lane.b32.xlu1 %v652_v3, %s1923_s22  ;;  %v523_v29 = vrot.slane %v2696_v57, 3  ;;  %v776_v3 = vrot.slane %v2707_v41, 4  ;;  %860 = vmatpush.msra.mxu1 %v838_v27  ;;  %v1036_v27 = vld [vmem:[#allocation7 + $0xb0] sm:$0xff]  ;;  %v2823_v41 = vmul.f32 %v2582_v46, %v2165_v14 }
  0xbf   :  { %402 = vrot.lane.b32.xlu0 %v3087_v55, %s1922_s19  ;;  %v2686_v33 = vpop.permute.xlu2 %398  ;;  %v743_v55 = vrot.slane %v2714_v26, 4  ;;  %915 = vmatpush.msra.mxu2 %v896_v50  ;;  %v1177_v57 = vld [vmem:[#allocation7 + $0x130] sm:$0xff] }
  0xc0   :  { %v2690_v35 = vpop.permute.xlu1 %306  ;;  %v524_v17 = vsel %vm521_vm2, %v522_v48, %v523_v29  ;;  %v777_v47 = vsel %vm679_vm3, %v774_v19, %v776_v3  ;;  %944 = vmatpush.msra.mxu3 %v923_v31  ;;  %886 = vmatpush.msrb.mxu1 %v869_v38  ;;  %v952_v19 = vld [vmem:[#allocation7 + $0x68] sm:$0xff]  ;;  %v680_v31 = vrot.slane %v671_v52, 4  ;;  %v1007_v52 = vld [vmem:[#allocation7 + $0x90] sm:$0xff] }
  0xc1   :  { %v2698_v9 = vpop.permute.xlu0 %653  ;;  %916 = vmatpush.msra.mxu2 %v895_v58  ;;  %v533_v56 = vadd.f32 %v524_v17, %v507_v37  ;;  %v744_v48 = vsel %vm679_vm3, %v741_v18, %v743_v55  ;;  %v1035_v37 = vld [vmem:[#allocation7 + $0xa8] sm:$0xff] }
  0xc2   :  { %1054 = vmatpush.msrb.mxu3 %v1037_v40 }
  0xc3   :  { %970 = vmatpush.msrb.mxu2 %v953_v28  ;;  %v566_v50 = vadd.f32 %v2620_v30, %v533_v56  ;;  %v951_v30 = vld [vmem:[#allocation7 + $0x60] sm:$0xff] }
  0xc4   :  { %1055 = vmatpush.msrb.mxu3 %v1036_v27 }
  0xc5   :  { %435 = vrot.lane.b32.xlu2 %v3088_v6, %s1924_s23  ;;  %v799_v6 = vmul.f32 %v2303_v16, %v2338_v22  ;;  %971 = vmatpush.msrb.mxu2 %v952_v19  ;;  %v2760_v16 = vmul.f32 %v2742_v34, %v2023_v5  ;;  %v599_v5 = vadd.f32 %v2546_v63, %v566_v50  ;;  %v1008_v50 = vld [vmem:[#allocation7 + $0x98] sm:$0xff] }
  0xc6   :  { %716 = vrot.lane.b32.xlu1 %v711_v21, %s1922_s19  ;;  %v868_v21 = vld [vmem:[#allocation7 + $0x20] sm:$0xff]  ;;  %1056 = vmatpush.msrb.mxu3 %v1035_v37 }
  0xc7   :  { %468 = vrot.lane.b32.xlu0 %v460_v15, %s1921_s18  ;;  %v2724_v20 = vpop.permute.xlu2 %431  ;;  %887 = vmatpush.msrb.mxu1 %v868_v21  ;;  %v809_v18 = vrot.slane %v799_v6, 4  ;;  %v681_v17 = vrot.slane %v2760_v16, 4  ;;  %v632_v38 = vadd.f32 %v2658_v61, %v599_v5  ;;  %v211_v21 = vrot.slane %v2765_v53, 1  ;;  %v980_v6 = vld [vmem:[#allocation7 + $0x80] sm:$0xff]  ;;  %v1373_v53 = vld [vmem:[#allocation7 + $0x1d8] sm:$0xff] }
  0xc8   :  { %v2728_v62 = vpop.permute.xlu1 %712  ;;  %972 = vmatpush.msrb.mxu2 %v951_v30 }
  0xc9   :  { %v2734_v15 = vpop.permute.xlu0 %339  ;;  %888 = vmatpush.msrb.mxu1 %v867_v7  ;;  %v810_v42 = vsel %vm679_vm3, %v807_v4, %v809_v18  ;;  %v682_v63 = vsel %vm679_vm3, %v680_v31, %v681_v17  ;;  %v212_v1 = vsel %vm205_vm0, %v209_v49, %v211_v21  ;;  %v1009_v7 = vld [vmem:[#allocation7 + $0xa0] sm:$0xff] }
  0xcd   :  { %501 = vrot.lane.b32.xlu2 %v493_v45, %s1923_s22 }
  0xce   :  { %782 = vrot.lane.b32.xlu1 %v777_v47, %s1921_s18 }
  0xcf   :  { %749 = vrot.lane.b32.xlu0 %v744_v48, %s1924_s23  ;;  %v243_v2 = vpop.permute.xlu2 %242 }
  0xd0   :  { %v158_v45 = vpop.permute.xlu1 %157 }
  0xd1   :  { %v167_v58 = vadd.f32 %v158_v45, %v2660_v11  ;;  %v746_v0 = vpop.permute.xlu0 %745  ;;  %v665_v11 = vadd.f32 %v2698_v9, %v632_v38  ;;  %v367_v45 = vrot.slane %v2823_v41, 2 }
  0xd3   :  { %v691_v9 = vadd.f32 %v682_v63, %v665_v11  ;;  %v368_v31 = vsel %vm363_vm1, %v365_v25, %v367_v45 }
  0xd5   :  { %560 = vrot.lane.b32.xlu2 %v552_v8, %s1922_s19  ;;  %v724_v10 = vadd.f32 %v2728_v62, %v691_v9  ;;  %v2806_v62 = vstv %s3066_s2 }
  0xd6   :  { %593 = vrot.lane.b32.xlu1 %v585_v43, %s1924_s23 }
  0xd7   :  { %815 = vrot.lane.b32.xlu0 %v810_v42, %s1923_s22  ;;  %v309_v23 = vpop.permute.xlu2 %308  ;;  %v757_v47 = vadd.f32 %v746_v0, %v724_v10  ;;  %v1121_v10 = vld [vmem:[#allocation7 + $0x100] sm:$0xff] }
  0xd8   :  { %v184_v4 = vpop.permute.xlu1 %183 }
  0xd9   :  { %v193_v8 = vadd.f32 %v184_v4, %v167_v58  ;;  %v779_v61 = vpop.permute.xlu0 %778 }
  0xda   :  { %v790_v49 = vadd.f32 %v779_v61, %v757_v47  ;;  %v1149_v47 = vld [vmem:[#allocation7 + $0x118] sm:$0xff] }
  0xdb   :  { %v219_v28 = vadd.f32 %v212_v1, %v193_v8  ;;  %v1065_v1 = vld [vmem:[#allocation7 + $0xd0] sm:$0xff] }
  0xdc   :  { %1082 = vmatpush.msra.mxu0 %v1065_v1  ;;  %v2881_v1 = vmul.f32 %v2582_v46, %v2338_v22 }
  0xdd   :  { %v252_v43 = vadd.f32 %v243_v2, %v219_v28  ;;  %626 = vrot.lane.b32.xlu2 %v618_v13, %s1921_s18  ;;  %v1093_v28 = vld [vmem:[#allocation7 + $0xe8] sm:$0xff] }
  0xde   :  { %718 = vrot.lane.b32.xlu1 %v710_v60, %s1922_s19 }
  0xdf   :  { %659 = vrot.lane.b32.xlu0 %v651_v54, %s1923_s22  ;;  %v2801_v39 = vpop.permute.xlu2 %341  ;;  %v981_v54 = vld [vmem:[#allocation7 + $0x88] sm:$0xff] }
  0xe0   :  { %v465_v40 = vpop.permute.xlu1 %464 }
  0xe1   :  { %v812_v12 = vpop.permute.xlu0 %811 }
  0xe2   :  { %v823_v13 = vadd.f32 %v812_v12, %v790_v49  ;;  %v1063_v49 = vld [vmem:[#allocation7 + $0xc0] sm:$0xff] }
  0xe3   :  { %v1092_v12 = vld [vmem:[#allocation7 + $0xe0] sm:$0xff] }
  0xe4   :  { %v829_v56 = vadd.f32 %v2806_v62, %v823_v13  ;;  %v1148_v13 = vld [vmem:[#allocation7 + $0x110] sm:$0xff] }
  0xe5   :  { %751 = vrot.lane.b32.xlu2 %v743_v55, %s1924_s23  ;;  %v979_v55 = vld [vmem:[#allocation7 + $0x78] sm:$0xff] }
  0xe6   :  { %v833_v51 = vmax.f32 %v829_v56, 0.0  ;;  %817 = vrot.lane.b32.xlu1 %v809_v18, %s1923_s22  ;;  %v317_v18 = vadd.f32 %v2690_v35, %v2677_v32  ;;  %v1091_v56 = vld [vmem:[#allocation7 + $0xd8] sm:$0xff] }
  0xe7   :  { %784 = vrot.lane.b32.xlu0 %v776_v3, %s1921_s18  ;;  %v2817_v26 = vpop.permute.xlu2 %622  ;;  %s1925_s18 = smov [#allocation8]  }
  0xe8   :  { %1809 = vmatmul.msk.f32.vlgmr.msra.gmra.mxu1 %vm841_vm4, %v833_v51  ;;  %v276_v59 = vpop.permute.xlu1 %275  ;;  %v898_v60 = vrot.slane %v833_v51, 2  ;;  %v926_v48 = vrot.slane %v833_v51, 3  ;;  %v870_v2 = vrot.slane %v833_v51, 1  ;;  %v954_v37 = vrot.slane %v833_v51, 4 }
  0xe9   :  { %v285_v19 = vadd.f32 %v276_v59, %v252_v43  ;;  %v498_v27 = vpop.permute.xlu0 %497  ;;  %998 = vmatpush.msra.mxu1 %v981_v54  ;;  %v1038_v58 = vrot.slane %v833_v51, 7  ;;  %v350_v5 = vadd.f32 %v2734_v15, %v317_v18  ;;  %v982_v38 = vrot.slane %v833_v51, 5  ;;  %v1147_v54 = vld [vmem:[#allocation7 + $0x108] sm:$0xff]  ;;  %v1232_v18 = vld [vmem:[#allocation7 + $0x158] sm:$0xff] }
  0xea   :  { %1811 = vmatmul.msk.f32.vlgmr.msra.gmra.mxu2 %vm841_vm4, %v898_v60  ;;  %1812 = vmatmul.msk.f32.vlgmr.msra.gmra.mxu3 %vm841_vm4, %v926_v48  ;;  %v1010_v11 = vrot.slane %v833_v51, 6  ;;  %v1119_v51 = vld [vmem:[#allocation7 + $0xf0] sm:$0xff]  ;;  %v1176_v48 = vld [vmem:[#allocation7 + $0x128] sm:$0xff] }
  0xeb   :  { %v2825_v3 = vadd.f32 %v309_v23, %v285_v19  ;;  %999 = vmatpush.msra.mxu1 %v980_v6  ;;  %1026 = vmatpush.msra.mxu2 %v1009_v7  ;;  %v376_v35 = vadd.f32 %v368_v31, %v350_v5  ;;  %v2850_v23 = vmul.f32 %v2680_v24, %v2165_v14  ;;  %v1205_v19 = vld [vmem:[#allocation7 + $0x148] sm:$0xff]  ;;  %v1231_v5 = vld [vmem:[#allocation7 + $0x150] sm:$0xff] }
  0xec   :  { %1166 = vmatpush.msra.mxu3 %v1149_v47  ;;  %v1259_v31 = vld [vmem:[#allocation7 + $0x168] sm:$0xff] }
  0xed   :  { %1000 = vmatpush.msra.mxu1 %v979_v55  ;;  %1027 = vmatpush.msra.mxu2 %v1008_v50  ;;  %v409_v63 = vadd.f32 %v2686_v33, %v376_v35  ;;  %v525_v4 = vrot.slane %v2850_v23, 3  ;;  %v1064_v33 = vld [vmem:[#allocation7 + $0xc8] sm:$0xff]  ;;  %v1261_v55 = vld [vmem:[#allocation7 + $0x178] sm:$0xff]  ;;  %v351_v16 = vadd.f32 %v2801_v39, %v2825_v3 }
  0xee   :  { %1083 = vmatpush.msra.mxu0 %v1064_v33  ;;  %1167 = vmatpush.msra.mxu3 %v1148_v13 }
  0xef   :  { %1028 = vmatpush.msra.mxu2 %v1007_v52  ;;  %v2841_v32 = vpop.permute.xlu2 %655  ;;  %v442_v25 = vadd.f32 %v2724_v20, %v409_v63  ;;  %v526_v20 = vsel %vm521_vm2, %v523_v29, %v525_v4  ;;  %v1175_v52 = vld [vmem:[#allocation7 + $0x120] sm:$0xff] }
  0xf0   :  { %1810 = vmatmul.msk.f32.vlgmr.msrb.gmra.mxu1 %vm841_vm4, %v870_v2  ;;  %v2831_v30 = vpop.permute.xlu1 %107  ;;  %1084 = vmatpush.msra.mxu0 %v1063_v49  ;;  %v1204_v2 = vld [vmem:[#allocation7 + $0x140] sm:$0xff] }
  0xf1   :  { %v557_v0 = vpop.permute.xlu0 %556  ;;  %v475_v8 = vadd.f32 %v465_v40, %v442_v25  ;;  %1110 = vmatpush.msrb.mxu1 %v1093_v28  ;;  %v1120_v40 = vld [vmem:[#allocation7 + $0xf8] sm:$0xff]  ;;  %1168 = vmatpush.msra.mxu3 %v1147_v54 }
  0xf2   :  { %1813 = vmatmul.msk.f32.vlgmr.msrb.gmra.mxu2 %vm841_vm4, %v954_v37  ;;  %1816 = vmatmul.msk.f32.vlgmr.msrb.gmra.mxu3 %vm841_vm4, %v1038_v58  ;;  %v2869_v37 = vmul.f32 %v2742_v34, %v2165_v14  ;;  %v1260_v58 = vld [vmem:[#allocation7 + $0x170] sm:$0xff] }
  0xf3   :  { %v508_v43 = vadd.f32 %v498_v27, %v475_v8  ;;  %1138 = vmatpush.msrb.mxu2 %v1121_v10  ;;  %1111 = vmatpush.msrb.mxu1 %v1092_v12  ;;  %v1233_v27 = vld [vmem:[#allocation7 + $0x160] sm:$0xff]  ;;  %v369_v10 = vrot.slane %v2881_v1, 2  ;;  %v1427_v1 = vld [vmem:[#allocation7 + $0x1f8] sm:$0xff] }
  0xf4   :  { %1194 = vmatpush.msrb.mxu0 %v1177_v57  ;;  %1278 = vmatpush.msrb.mxu3 %v1261_v55  ;;  %v2905_v57 = vmul.f32 %v2680_v24, %v2338_v22 }
  0xf5   :  { %1139 = vmatpush.msrb.mxu2 %v1120_v40  ;;  %v534_v59 = vadd.f32 %v526_v20, %v508_v43  ;;  %1112 = vmatpush.msrb.mxu1 %v1091_v56  ;;  %v370_v46 = vsel %vm363_vm1, %v367_v45, %v369_v10 }
  0xf6   :  { %1195 = vmatpush.msrb.mxu0 %v1176_v48  ;;  %1279 = vmatpush.msrb.mxu3 %v1260_v58  ;;  %v377_v13 = vadd.f32 %v370_v46, %v351_v16  ;;  %v1485_v46 = vld [vmem:[#allocation7 + $0x238] sm:$0xff] }
  0xf7   :  { %v2852_v44 = vpop.permute.xlu2 %466  ;;  %1140 = vmatpush.msrb.mxu2 %v1119_v51  ;;  %v567_v29 = vadd.f32 %v557_v0, %v534_v59  ;;  %v1203_v0 = vld [vmem:[#allocation7 + $0x138] sm:$0xff] }
  0xf8   :  { %1814 = vmatmul.msk.f32.vlgmr.msra.gmra.mxu1 %vm841_vm4, %v982_v38  ;;  %v2844_v42 = vpop.permute.xlu1 %133  ;;  %1196 = vmatpush.msrb.mxu0 %v1175_v52  ;;  %v683_v38 = vrot.slane %v2869_v37, 4  ;;  %v1345_v52 = vld [vmem:[#allocation7 + $0x1c0] sm:$0xff] }
  0xf9   :  { %v590_v15 = vpop.permute.xlu0 %589  ;;  %1222 = vmatpush.msra.mxu1 %v1205_v19  ;;  %1280 = vmatpush.msrb.mxu3 %v1259_v31  ;;  %v1289_v19 = vld [vmem:[#allocation7 + $0x190] sm:$0xff]  ;;  %v1344_v31 = vld [vmem:[#allocation7 + $0x1b8] sm:$0xff] }
  0xfa   :  { %1815 = vmatmul.msk.f32.vlgmr.msra.gmra.mxu2 %vm841_vm4, %v1010_v11  ;;  %v600_v50 = vadd.f32 %v590_v15, %v567_v29  ;;  %v684_v25 = vsel %vm679_vm3, %v681_v17, %v683_v38 }
  0xfb   :  { %1250 = vmatpush.msra.mxu2 %v1233_v27  ;;  %1223 = vmatpush.msra.mxu1 %v1204_v2  ;;  %v1288_v2 = vld [vmem:[#allocation7 + $0x188] sm:$0xff] }
  0xfc   :  { %v633_v35 = vadd.f32 %v2817_v26, %v600_v50 }
  0xfd   :  { %1251 = vmatpush.msra.mxu2 %v1232_v18  ;;  %1224 = vmatpush.msra.mxu1 %v1203_v0  ;;  %v1317_v18 = vld [vmem:[#allocation7 + $0x1a8] sm:$0xff]  ;;  %v1287_v0 = vld [vmem:[#allocation7 + $0x180] sm:$0xff] }
  0xfe   :  { %v666_v63 = vadd.f32 %v2841_v32, %v633_v35  ;;  %v86_v32 = vmul.f32 %v2478_v36, %v2338_v22 }
  0xff   :  { %v2865_v60 = vpop.permute.xlu2 %499  ;;  %1252 = vmatpush.msra.mxu2 %v1231_v5  ;;  %v1316_v5 = vld [vmem:[#allocation7 + $0x1a0] sm:$0xff] }
 0x100   :  { %v2856_v61 = vpop.permute.xlu1 %400  ;;  %v692_v26 = vadd.f32 %v684_v25, %v666_v63  ;;  %v116_v12 = vadd.f32 %v2831_v30, %v86_v32  ;;  %v1315_v63 = vld [vmem:[#allocation7 + $0x198] sm:$0xff]  ;;  %v1343_v25 = vld [vmem:[#allocation7 + $0x1b0] sm:$0xff]  ;;  %v1429_v32 = vld [vmem:[#allocation7 + $0x208] sm:$0xff] }
 0x101   :  { %v2858_v9 = vpop.permute.xlu0 %159  ;;  %v410_v39 = vadd.f32 %v2856_v61, %v377_v13 }
 0x102   :  { %v142_v36 = vadd.f32 %v2844_v42, %v116_v12  ;;  %v1428_v12 = vld [vmem:[#allocation7 + $0x200] sm:$0xff] }
 0x104   :  { %v168_v3 = vadd.f32 %v2858_v9, %v142_v36  ;;  %v1483_v36 = vld [vmem:[#allocation7 + $0x228] sm:$0xff] }
 0x107   :  { %v781_v15 = vpop.permute.xlu2 %780 }
 0x108   :  { %v434_v6 = vpop.permute.xlu1 %433 }
 0x109   :  { %v186_v7 = vpop.permute.xlu0 %185  ;;  %v443_v59 = vadd.f32 %v434_v6, %v410_v39 }
 0x10a   :  { %v194_v30 = vadd.f32 %v186_v7, %v168_v3  ;;  %v527_v7 = vrot.slane %v2905_v57, 3  ;;  %v1569_v57 = vld [vmem:[#allocation7 + $0x280] sm:$0xff] }
 0x10b   :  { %v476_v48 = vadd.f32 %v2852_v44, %v443_v59 }
 0x10c   :  { %v220_v29 = vadd.f32 %v211_v21, %v194_v30  ;;  %v528_v21 = vsel %vm521_vm2, %v525_v4, %v527_v7  ;;  %v1371_v4 = vld [vmem:[#allocation7 + $0x1c8] sm:$0xff] }
 0x10d   :  { %v509_v58 = vadd.f32 %v2865_v60, %v476_v48 }
 0x10f   :  { %v814_v47 = vpop.permute.xlu2 %813  ;;  %v535_v23 = vadd.f32 %v528_v21, %v509_v58 }
 0x110   :  { %v245_v11 = vpop.permute.xlu1 %244 }
 0x111   :  { %v715_v14 = vpop.permute.xlu0 %714  ;;  %v253_v27 = vadd.f32 %v245_v11, %v220_v29  ;;  %v1372_v11 = vld [vmem:[#allocation7 + $0x1d0] sm:$0xff] }
 0x112   :  { %v725_v8 = vadd.f32 %v715_v14, %v692_v26 }
 0x117   :  { %v2908_v42 = vpop.permute.xlu2 %624 }
 0x118   :  { %v278_v33 = vpop.permute.xlu1 %277 }
 0x119   :  { %v748_v28 = vpop.permute.xlu0 %747  ;;  %v286_v44 = vadd.f32 %v278_v33, %v253_v27 }
 0x11a   :  { %v758_v43 = vadd.f32 %v748_v28, %v725_v8  ;;  %v1401_v8 = vld [vmem:[#allocation7 + $0x1f0] sm:$0xff]  ;;  %v2927_v28 = vmul.f32 %v2742_v34, %v2338_v22 }
 0x11b   :  { %v1484_v22 = vld [vmem:[#allocation7 + $0x230] sm:$0xff] }
 0x11c   :  { %v791_v49 = vadd.f32 %v781_v15, %v758_v43  ;;  %v1457_v43 = vld [vmem:[#allocation7 + $0x220] sm:$0xff]  ;;  %v685_v34 = vrot.slane %v2927_v28, 4  ;;  %v1539_v28 = vld [vmem:[#allocation7 + $0x258] sm:$0xff] }
 0x11e   :  { %v824_v17 = vadd.f32 %v814_v47, %v791_v49  ;;  %v1400_v47 = vld [vmem:[#allocation7 + $0x1e8] sm:$0xff] }
 0x11f   :  { %v436_v14 = vpop.permute.xlu2 %435 }
 0x120   :  { %v830_v20 = vadd.f32 %v2806_v62, %v824_v17  ;;  %v2895_v40 = vpop.permute.xlu1 %558  ;;  %v1399_v17 = vld [vmem:[#allocation7 + $0x1e0] sm:$0xff] }
 0x121   :  { %v311_v56 = vpop.permute.xlu0 %310  ;;  %v568_v33 = vadd.f32 %v2895_v40, %v535_v23  ;;  %v1567_v23 = vld [vmem:[#allocation7 + $0x270] sm:$0xff] }
 0x122   :  { %v834_v51 = vmax.f32 %v830_v20, 0.0  ;;  %v319_v35 = vadd.f32 %v311_v56, %v286_v44  ;;  %v1456_v20 = vld [vmem:[#allocation7 + $0x218] sm:$0xff] }
 0x124   :  { %1817 = vmatmul.msk.f32.vlgmr.msra.gmra.mxu0 %vm841_vm4, %v834_v51  ;;  %v1094_v41 = vrot.slane %v834_v51, 1  ;;  %v1122_v45 = vrot.slane %v834_v51, 2  ;;  %v1150_v54 = vrot.slane %v834_v51, 3  ;;  %v1178_v6 = vrot.slane %v834_v51, 4 }
 0x125   :  { %v1206_v24 = vrot.slane %v834_v51, 5  ;;  %v1234_v55 = vrot.slane %v834_v51, 6  ;;  %v1262_v50 = vrot.slane %v834_v51, 7  ;;  %1306 = vmatpush.msra.mxu0 %v1289_v19 }
 0x126   :  { %1818 = vmatmul.msk.f32.vlgmr.msrb.gmra.mxu1 %vm841_vm4, %v1094_v41  ;;  %1819 = vmatmul.msk.f32.vlgmr.msrb.gmra.mxu2 %vm841_vm4, %v1122_v45  ;;  %v686_v45 = vsel %vm679_vm3, %v683_v38, %v685_v34 }
 0x127   :  { %1820 = vmatmul.msk.f32.vlgmr.msra.gmra.mxu3 %vm841_vm4, %v1150_v54  ;;  %1362 = vmatpush.msrb.mxu2 %v1345_v52  ;;  %v502_v39 = vpop.permute.xlu2 %501 }
 0x128   :  { %v592_v61 = vpop.permute.xlu1 %591  ;;  %1307 = vmatpush.msra.mxu0 %v1288_v2  ;;  %1334 = vmatpush.msrb.mxu1 %v1317_v18  ;;  %v1513_v18 = vld [vmem:[#allocation7 + $0x250] sm:$0xff] }
 0x129   :  { %v344_v9 = vpop.permute.xlu0 %343  ;;  %1390 = vmatpush.msra.mxu3 %v1373_v53  ;;  %1363 = vmatpush.msrb.mxu2 %v1344_v31  ;;  %v601_v49 = vadd.f32 %v592_v61, %v568_v33  ;;  %v1512_v31 = vld [vmem:[#allocation7 + $0x248] sm:$0xff] }
 0x12a   :  { %v352_v26 = vadd.f32 %v344_v9, %v319_v35  ;;  %1308 = vmatpush.msra.mxu0 %v1287_v0  ;;  %1335 = vmatpush.msrb.mxu1 %v1316_v5  ;;  %v1597_v5 = vld [vmem:[#allocation7 + $0x298] sm:$0xff] }
 0x12b   :  { %1391 = vmatpush.msra.mxu3 %v1372_v11  ;;  %1364 = vmatpush.msrb.mxu2 %v1343_v25  ;;  %v634_v51 = vadd.f32 %v2908_v42, %v601_v49  ;;  %v1568_v11 = vld [vmem:[#allocation7 + $0x278] sm:$0xff]  ;;  %v1540_v25 = vld [vmem:[#allocation7 + $0x260] sm:$0xff] }
 0x12c   :  { %1821 = vmatmul.msk.f32.vlgmr.msrb.gmra.mxu0 %vm841_vm4, %v1178_v6  ;;  %1336 = vmatpush.msrb.mxu1 %v1315_v63  ;;  %v378_v16 = vadd.f32 %v369_v10, %v352_v26  ;;  %v1455_v10 = vld [vmem:[#allocation7 + $0x210] sm:$0xff] }
 0x12d   :  { %1418 = vmatpush.msrb.mxu0 %v1401_v8  ;;  %1392 = vmatpush.msra.mxu3 %v1371_v4  ;;  %v1595_v4 = vld [vmem:[#allocation7 + $0x288] sm:$0xff] }
 0x12e   :  { %1822 = vmatmul.msk.f32.vlgmr.msra.gmra.mxu1 %vm841_vm4, %v1206_v24  ;;  %1823 = vmatmul.msk.f32.vlgmr.msra.gmra.mxu2 %vm841_vm4, %v1234_v55 }
 0x12f   :  { %1824 = vmatmul.msk.f32.vlgmr.msrb.gmra.mxu3 %vm841_vm4, %v1262_v50  ;;  %1474 = vmatpush.msra.mxu2 %v1457_v43  ;;  %v561_v6 = vpop.permute.xlu2 %560 }
 0x130   :  { %v658_v60 = vpop.permute.xlu1 %657  ;;  %1419 = vmatpush.msrb.mxu0 %v1400_v47  ;;  %1446 = vmatpush.msra.mxu1 %v1429_v32 }
 0x131   :  { %v403_v15 = vpop.permute.xlu0 %402  ;;  %1502 = vmatpush.msrb.mxu3 %v1485_v46  ;;  %1475 = vmatpush.msra.mxu2 %v1456_v20  ;;  %v667_v3 = vadd.f32 %v658_v60, %v634_v51  ;;  %v1541_v60 = vld [vmem:[#allocation7 + $0x268] sm:$0xff] }
 0x132   :  { %v411_v40 = vadd.f32 %v403_v15, %v378_v16  ;;  %1420 = vmatpush.msrb.mxu0 %v1399_v17  ;;  %1447 = vmatpush.msra.mxu1 %v1428_v12  ;;  %v1596_v15 = vld [vmem:[#allocation7 + $0x290] sm:$0xff] }
 0x133   :  { %1503 = vmatpush.msrb.mxu3 %v1484_v22  ;;  %1476 = vmatpush.msra.mxu2 %v1455_v10  ;;  %v693_v59 = vadd.f32 %v686_v45, %v667_v3  ;;  %v837_v10 = vld [vmem:[%s3068_s4] sm:$0x1] }
 0x134   :  { %1448 = vmatpush.msra.mxu1 %v1427_v1  ;;  %v444_v41 = vadd.f32 %v436_v14, %v411_v40  ;;  %v1511_v14 = vld [vmem:[#allocation7 + $0x240] sm:$0xff] }
 0x135   :  { %1504 = vmatpush.msrb.mxu3 %v1483_v36 }
 0x137   :  { %v627_v38 = vpop.permute.xlu2 %626 }
 0x138   :  { %v717_v13 = vpop.permute.xlu1 %716 }
 0x139   :  { %v469_v56 = vpop.permute.xlu0 %468  ;;  %v726_v9 = vadd.f32 %v717_v13, %v693_v59 }
 0x13a   :  { %v477_v54 = vadd.f32 %v469_v56, %v444_v41 }
 0x13c   :  { %v510_v48 = vadd.f32 %v502_v39, %v477_v54 }
 0x13e   :  { %v536_v42 = vadd.f32 %v527_v7, %v510_v48  ;;  %v1638_v48 = vld [vmem:[%s3069_s5 + $0x68] sm:$0xff] }
 0x13f   :  { %v752_v26 = vpop.permute.xlu2 %751 }
 0x140   :  { %v783_v30 = vpop.permute.xlu1 %782  ;;  %v569_v55 = vadd.f32 %v561_v6, %v536_v42 }
 0x141   :  { %v750_v61 = vpop.permute.xlu0 %749 }
 0x142   :  { %v759_v29 = vadd.f32 %v750_v61, %v726_v9 }
 0x144   :  { %v792_v27 = vadd.f32 %v783_v30, %v759_v29 }
 0x148   :  { %v594_v19 = vpop.permute.xlu1 %593 }
 0x149   :  { %v816_v24 = vpop.permute.xlu0 %815  ;;  %v602_v52 = vadd.f32 %v594_v19, %v569_v55 }
 0x14a   :  { %v825_v50 = vadd.f32 %v816_v24, %v792_v27  ;;  %v1637_v24 = vld [vmem:[%s3069_s5 + $0x60] sm:$0xff] }
 0x14b   :  { %v635_v58 = vadd.f32 %v627_v38, %v602_v52 }
 0x14c   :  { %v831_v37 = vadd.f32 %v2806_v62, %v825_v50  ;;  %v1636_v50 = vld [vmem:[%s3069_s5 + $0x58] sm:$0xff] }
 0x14e   :  { %v835_v2 = vmax.f32 %v831_v37, 0.0  ;;  %v1635_v37 = vld [vmem:[%s3069_s5 + $0x50] sm:$0xff] }
 0x150   :  { %1825 = vmatmul.msk.f32.vlgmr.msra.gmra.mxu0 %vm841_vm4, %v835_v2  ;;  %v1318_v44 = vrot.slane %v835_v2, 1  ;;  %v1346_v53 = vrot.slane %v835_v2, 2  ;;  %v1374_v21 = vrot.slane %v835_v2, 3  ;;  %v719_v0 = vpop.permute.xlu1 %718  ;;  %v1402_v33 = vrot.slane %v835_v2, 4 }
 0x151   :  { %v660_v7 = vpop.permute.xlu0 %659  ;;  %1530 = vmatpush.msra.mxu0 %v1513_v18  ;;  %v1430_v47 = vrot.slane %v835_v2, 5  ;;  %v1458_v32 = vrot.slane %v835_v2, 6  ;;  %v1486_v16 = vrot.slane %v835_v2, 7  ;;  %v1634_v2 = vld [vmem:[%s3069_s5 + $0x48] sm:$0xff] }
 0x152   :  { %v668_v35 = vadd.f32 %v660_v7, %v635_v58  ;;  %1826 = vmatmul.msk.f32.vlgmr.msrb.gmra.mxu1 %vm841_vm4, %v1318_v44  ;;  %1827 = vmatmul.msk.f32.vlgmr.msrb.gmra.mxu2 %vm841_vm4, %v1346_v53  ;;  %v1633_v58 = vld [vmem:[%s3069_s5 + $0x40] sm:$0xff]  ;;  %v1632_v53 = vld [vmem:[%s3069_s5 + $0x38] sm:$0xff]  ;;  %v1630_v7 = vld [vmem:[%s3069_s5 + $0x28] sm:$0xff] }
 0x153   :  { %1828 = vmatmul.msk.f32.vlgmr.msra.gmra.mxu3 %vm841_vm4, %v1374_v21  ;;  %1586 = vmatpush.msrb.mxu2 %v1569_v57 }
 0x154   :  { %v694_v63 = vadd.f32 %v685_v34, %v668_v35  ;;  %1614 = vmatpush.msra.mxu3 %v1597_v5  ;;  %1531 = vmatpush.msra.mxu0 %v1512_v31  ;;  %v1629_v5 = vld [vmem:[%s3069_s5 + $0x20] sm:$0xff] }
 0x155   :  { %1558 = vmatpush.msrb.mxu1 %v1541_v60  ;;  %1587 = vmatpush.msrb.mxu2 %v1568_v11  ;;  %v1628_v11 = vld [vmem:[%s3069_s5 + $0x18] sm:$0xff] }
 0x156   :  { %v727_v8 = vadd.f32 %v719_v0, %v694_v63  ;;  %1532 = vmatpush.msra.mxu0 %v1511_v14  ;;  %1615 = vmatpush.msra.mxu3 %v1596_v15  ;;  %v1631_v0 = vld [vmem:[%s3069_s5 + $0x30] sm:$0xff]  ;;  %v1626_v63 = vld [vmem:[%s3069_s5 + $0x8] sm:$0xff] }
 0x157   :  { %1559 = vmatpush.msrb.mxu1 %v1540_v25  ;;  %1588 = vmatpush.msrb.mxu2 %v1567_v23  ;;  %v1627_v14 = vld [vmem:[%s3069_s5 + $0x10] sm:$0xff] }
 0x158   :  { %v760_v43 = vadd.f32 %v752_v26, %v727_v8  ;;  %1829 = vmatmul.msk.f32.vlgmr.msrb.gmra.mxu0 %vm841_vm4, %v1402_v33  ;;  %1616 = vmatpush.msra.mxu3 %v1595_v4  ;;  %v818_v46 = vpop.permute.xlu1 %817  ;;  %v1625_v26 = vld [vmem:[%s3069_s5] sm:$0xff]  ;;  %v1668_v8 = vld [vmem:[%s3071_s7 + $0x18] sm:$0xf]  ;;  %v1667_v33 = vld [vmem:[%s3071_s7 + $0x10] sm:$0xff] }
 0x159   :  { %v785_v49 = vpop.permute.xlu0 %784  ;;  %1560 = vmatpush.msrb.mxu1 %v1539_v28  ;;  %1646 = vmatpush.msrb.mxu0 %v1638_v48 }
 0x15a   :  { %v793_v17 = vadd.f32 %v785_v49, %v760_v43  ;;  %1830 = vmatmul.msk.f32.vlgmr.msra.gmra.mxu1 %vm841_vm4, %v1430_v47  ;;  %1831 = vmatmul.msk.f32.vlgmr.msra.gmra.mxu2 %vm841_vm4, %v1458_v32 }
 0x15b   :  { %1832 = vmatmul.msk.f32.vlgmr.msrb.gmra.mxu3 %vm841_vm4, %v1486_v16  ;;  %1647 = vmatpush.msrb.mxu0 %v1637_v24  ;;  %v1734_v24 = vld [vmem:[%s3075_s11 + $0x30] sm:$0xff] }
 0x15c   :  { %v826_v12 = vadd.f32 %v818_v46, %v793_v17  ;;  %1838 = vmatpush.msk.msra.mxu1 %vm679_vm3, %v1668_v8 }
 0x15d   :  { %1648 = vmatpush.msrb.mxu0 %v1636_v50  ;;  %v1732_v50 = vld [vmem:[%s3075_s11 + $0x20] sm:$0xff] }
 0x15e   :  { %v832_v20 = vadd.f32 %v2806_v62, %v826_v12  ;;  %1690 = vmatpush.msra.mxu1 %v1667_v33 }
 0x15f   :  { %1649 = vmatpush.msrb.mxu0 %v1635_v37  ;;  %v1669_v37 = vld [vmem:[%s3072_s8] sm:$0x1] }
 0x160   :  { %v836_v40 = vmax.f32 %v832_v20, 0.0 }
 0x161   :  { %1650 = vmatpush.msrb.mxu0 %v1634_v2 }
 0x162   :  { %v1542_v13 = vrot.slane %v836_v40, 1  ;;  %v1570_v22 = vrot.slane %v836_v40, 2  ;;  %v1598_v34 = vrot.slane %v836_v40, 3  ;;  %1833 = vmatmul.msk.f32.vlgmr.msra.gmra.mxu0 %vm841_vm4, %v836_v40 }
 0x163   :  { %1651 = vmatpush.msrb.mxu0 %v1633_v58  ;;  %v1730_v58 = vld [vmem:[%s3075_s11 + $0x10] sm:$0xff] }
 0x164   :  { %1834 = vmatmul.msk.f32.vlgmr.msrb.gmra.mxu1 %vm841_vm4, %v1542_v13  ;;  %1835 = vmatmul.msk.f32.vlgmr.msrb.gmra.mxu2 %vm841_vm4, %v1570_v22 }
 0x165   :  { %1836 = vmatmul.msk.f32.vlgmr.msra.gmra.mxu3 %vm841_vm4, %v1598_v34  ;;  %v862_v56 = vpop.f32.mrf.mxu1  ;;  %1652 = vmatpush.msrb.mxu0 %v1632_v53  ;;  %v1728_v53 = vld [vmem:[%s3075_s11] sm:$0xff] }
 0x166   :  { %v865_v62 = vadd.f32 %v862_v56, %v837_v10 }
 0x167   :  { %1653 = vmatpush.msrb.mxu0 %v1631_v0 }
 0x169   :  { %1654 = vmatpush.msrb.mxu0 %v1630_v7 }
 0x16b   :  { %1655 = vmatpush.msrb.mxu0 %v1629_v5  ;;  %v1736_v5 = vld [vmem:[%s3076_s12] sm:$0x1] }
 0x16d   :  { %v918_v1 = vpop.f32.mrf.mxu2  ;;  %v890_v36 = vpop.f32.mrf.mxu1  ;;  %1656 = vmatpush.msrb.mxu0 %v1628_v11 }
 0x16e   :  { %v893_v51 = vadd.f32 %v890_v36, %v865_v62  ;;  %v946_v41 = vpop.f32.mrf.mxu3 }
 0x16f   :  { %1657 = vmatpush.msrb.mxu0 %v1627_v14 }
 0x170   :  { %v921_v3 = vadd.f32 %v918_v1, %v893_v51 }
 0x171   :  { %1658 = vmatpush.msrb.mxu0 %v1626_v63 }
 0x172   :  { %v949_v45 = vadd.f32 %v946_v41, %v921_v3 }
 0x173   :  { %1659 = vmatpush.msrb.mxu0 %v1625_v26 }
 0x175   :  { %v974_v39 = vpop.f32.mrf.mxu2  ;;  %v1002_v59 = vpop.f32.mrf.mxu1 }
 0x176   :  { %v977_v54 = vadd.f32 %v974_v39, %v949_v45  ;;  %v1058_v29 = vpop.f32.mrf.mxu3 }
 0x178   :  { %v1005_v61 = vadd.f32 %v1002_v59, %v977_v54  ;;  %v1666_v54 = vld [vmem:[%s3071_s7 + $0x8] sm:$0xff]  ;;  %v1665_v59 = vld [vmem:[%s3071_s7] sm:$0xff]  ;;  %s1768_s7 = sshll.u32 %s1925_s18, 4  ;;  %s1769_s7 = int_to_ptr.vmem [resolvable:$true] %s1768_s7 }
 0x179   :  { %1691 = vmatpush.msra.mxu1 %v1666_v54 }
 0x17b   :  { %1692 = vmatpush.msra.mxu1 %v1665_v59 }
 0x17d   :  { %v1030_v30 = vpop.f32.mrf.mxu2 }
 0x17e   :  { %v1033_v9 = vadd.f32 %v1030_v30, %v1005_v61  ;;  %v1701_v30 = vld [vmem:[%s3073_s9 + $0x18] sm:$0xff]  ;;  %v1700_v61 = vld [vmem:[%s3073_s9 + $0x10] sm:$0xff] }
 0x17f   :  { %1719 = vmatpush.msra.mxu2 %v1701_v30 }
 0x180   :  { %v1061_v42 = vadd.f32 %v1058_v29, %v1033_v9  ;;  %v1639_v9 = vld [vmem:[%s3070_s6] sm:$0x1] }
 0x181   :  { %1720 = vmatpush.msra.mxu2 %v1700_v61 }
 0x1a1   :  { %v1086_v6 = vpop.f32.mrf.mxu0 }
 0x1a2   :  { %v1089_v19 = vadd.f32 %v1086_v6, %v1061_v42  ;;  %v1699_v42 = vld [vmem:[%s3073_s9 + $0x8] sm:$0xff] }
 0x1a3   :  { %v1114_v27 = vpop.f32.mrf.mxu1  ;;  %1721 = vmatpush.msra.mxu2 %v1699_v42 }
 0x1a4   :  { %v1117_v52 = vadd.f32 %v1114_v27, %v1089_v19  ;;  %v1698_v19 = vld [vmem:[%s3073_s9] sm:$0xff]  ;;  %v1735_v27 = vld [vmem:[%s3075_s11 + $0x38] sm:$0xff] }
 0x1a5   :  { %1722 = vmatpush.msra.mxu2 %v1698_v19  ;;  %1749 = vmatpush.msrb.mxu3 %v1735_v27 }
 0x1a7   :  { %1750 = vmatpush.msrb.mxu3 %v1734_v24 }
 0x1a9   :  { %v1142_v55 = vpop.f32.mrf.mxu2  ;;  %v1198_v21 = vpop.f32.mrf.mxu0 }
 0x1aa   :  { %v1145_v38 = vadd.f32 %v1142_v55, %v1117_v52  ;;  %v1170_v18 = vpop.f32.mrf.mxu3  ;;  %v1733_v55 = vld [vmem:[%s3075_s11 + $0x28] sm:$0xff]  ;;  %v1731_v52 = vld [vmem:[%s3075_s11 + $0x18] sm:$0xff] }
 0x1ab   :  { %v1226_v31 = vpop.f32.mrf.mxu1  ;;  %1751 = vmatpush.msrb.mxu3 %v1733_v55 }
 0x1ac   :  { %v1173_v44 = vadd.f32 %v1170_v18, %v1145_v38 }
 0x1ad   :  { %1752 = vmatpush.msrb.mxu3 %v1732_v50 }
 0x1ae   :  { %v1201_v57 = vadd.f32 %v1198_v21, %v1173_v44  ;;  %v1729_v44 = vld [vmem:[%s3075_s11 + $0x8] sm:$0xff]  ;;  %v1702_v21 = vld [vmem:[%s3074_s10] sm:$0x1]  ;;  %s1770_s11 = sshll.u32 %s3077_s13, 4  ;;  %s1771_s11 = int_to_ptr.hbm [resolvable:$true] %s1770_s11 }
 0x1af   :  { %1753 = vmatpush.msrb.mxu3 %v1731_v52 }
 0x1b0   :  { %v1229_v35 = vadd.f32 %v1226_v31, %v1201_v57 }
 0x1b1   :  { %v1254_v60 = vpop.f32.mrf.mxu2  ;;  %1754 = vmatpush.msrb.mxu3 %v1730_v58 }
 0x1b2   :  { %v1257_v15 = vadd.f32 %v1254_v60, %v1229_v35  ;;  %v1282_v25 = vpop.f32.mrf.mxu3 }
 0x1b3   :  { %1755 = vmatpush.msrb.mxu3 %v1729_v44 }
 0x1b4   :  { %v1285_v4 = vadd.f32 %v1282_v25, %v1257_v15 }
 0x1b5   :  { %1756 = vmatpush.msrb.mxu3 %v1728_v53 }
 0x1cd   :  { %v1310_v23 = vpop.f32.mrf.mxu0 }
 0x1ce   :  { %v1313_v28 = vadd.f32 %v1310_v23, %v1285_v4 }
 0x1cf   :  { %v1338_v43 = vpop.f32.mrf.mxu1 }
 0x1d0   :  { %v1341_v47 = vadd.f32 %v1338_v43, %v1313_v28 }
 0x1d5   :  { %v1366_v32 = vpop.f32.mrf.mxu2  ;;  %v1422_v17 = vpop.f32.mrf.mxu0 }
 0x1d6   :  { %v1369_v49 = vadd.f32 %v1366_v32, %v1341_v47  ;;  %v1394_v16 = vpop.f32.mrf.mxu3 }
 0x1d7   :  { %v1450_v20 = vpop.f32.mrf.mxu1 }
 0x1d8   :  { %v1397_v46 = vadd.f32 %v1394_v16, %v1369_v49 }
 0x1da   :  { %v1425_v12 = vadd.f32 %v1422_v17, %v1397_v46 }
 0x1dc   :  { %v1453_v40 = vadd.f32 %v1450_v20, %v1425_v12 }
 0x1dd   :  { %v1478_v13 = vpop.f32.mrf.mxu2 }
 0x1de   :  { %v1481_v22 = vadd.f32 %v1478_v13, %v1453_v40  ;;  %v1506_v34 = vpop.f32.mrf.mxu3 }
 0x1df   :  { %v1534_v1 = vpop.f32.mrf.mxu0 }
 0x1e0   :  { %v1509_v56 = vadd.f32 %v1506_v34, %v1481_v22 }
 0x1e1   :  { %v1562_v36 = vpop.f32.mrf.mxu1 }
 0x1e2   :  { %v1537_v10 = vadd.f32 %v1534_v1, %v1509_v56 }
 0x1e4   :  { %v1565_v62 = vadd.f32 %v1562_v36, %v1537_v10 }
 0x1e7   :  { %v1590_v51 = vpop.f32.mrf.mxu2 }
 0x1e8   :  { %v1593_v39 = vadd.f32 %v1590_v51, %v1565_v62  ;;  %v1618_v3 = vpop.f32.mrf.mxu3 }
 0x1ea   :  { %v1621_v41 = vadd.f32 %v1618_v3, %v1593_v39 }
 0x1ec   :  { %v1622_v45 = vmax.f32 %v1621_v41, 0.0 }
 0x1ee   :  { %1624 = vst.msk [vmem:[%s3078_s14] sm:$0x1] %vm1623_vm5, %v1622_v45  ;;  %1837 = vmatmul.msk.f32.vlgmr.msrb.gmra.mxu0 %vm1640_vm6, %v1622_v45 }
 0x26b   :  { %v1661_v48 = vpop.f32.mrf.mxu0 }
 0x26c   :  { %v1662_v29 = vadd.f32 %v1661_v48, %v1639_v9 }
 0x26e   :  { %v1664_v6 = vmax.f32 %v1662_v29, 0.0 }
 0x270   :  { %1839 = vmatmul.msk.f32.vlgmr.msra.gmra.mxu1 %vm1670_vm7, %v1664_v6 }
 0x2ed   :  { %v1694_v38 = vpop.f32.mrf.mxu1 }
 0x2ee   :  { %v1695_v2 = vadd.f32 %v1694_v38, %v1669_v37 }
 0x2f0   :  { %v1697_v18 = vmax.f32 %v1695_v2, 0.0 }
 0x2f2   :  { %1840 = vmatmul.msk.f32.vlgmr.msra.gmra.mxu2 %vm1703_vm8, %v1697_v18 }
 0x375   :  { %v1724_v0 = vpop.f32.mrf.mxu2 }
 0x376   :  { %v1725_v57 = vadd.f32 %v1724_v0, %v1702_v21 }
 0x378   :  { %v1727_v7 = vmax.f32 %v1725_v57, 0.0 }
 0x37a   :  { %1841 = vmatmul.msk.f32.vlgmr.msrb.gmra.mxu3 %vm1737_vm9, %v1727_v7 }
 0x3fd   :  { %v1758_v31 = vpop.f32.mrf.mxu3 }
 0x3fe   :  { %v1759_v35 = vadd.f32 %v1758_v31, %v1736_v5 }
 0x400   :  { %1762 = vst.msk [vmem:[#allocation8] sm:$0x1] %vm1761_vm10, %v1759_v35 }
 0x401   :  { %1773 = dma.vmem_to_hbm [thread:$0]  %s1769_s7, 16, %s1771_s11, [#allocation5]  }
 0x402   :  { %1915 = dma.done.wait [#allocation5], 16  }
 0x403   :  { %1916 = vsyncadd [#allocation5], 4294967280 }
 0x404   :  { %1782 = vsyncpa [#allocation4], 1 }
 0x405   :  { %1783 = vsyncpa [#allocation5], 1 }
 0x406   :  { %1784 = vsyncpa [#allocation6], 1 }

</bundles_post_ra>
